<compile_context>
chip_gen: v7x
topology: tpu7x:2x2x1
jax: 0.10.0
libtpu: 0.0.40
codegen_flags: <defaults>
</compile_context>

<pallas_src>
import functools

import jax
import jax.numpy as jnp
from jax import lax
from jax.experimental import pallas as pl
from jax.experimental.pallas import tpu as pltpu

# Set True on v6e/v7x to feed the MXU bf16 operands in the large NON-recurrent
# matmuls (input projection + FC head) for higher MXU throughput.  Default
# False to keep fp32 parity with the PyTorch module.
USE_BF16_MATMUL = False


def _round_up(n, m):
    return (n + m - 1) // m * m


# ---------------------------------------------------------------------------
# Generic (M,K) x (K,N) + bias kernel.  Used for the hoisted LSTM input
# projection (one matmul over all T timesteps at once) and for the FC head.
# Callers always pad N to a multiple of 128 -> lane-dense, unmasked stores.
# ---------------------------------------------------------------------------
def _matmul_bias_kernel(x_ref, w_ref, b_ref, o_ref, *, use_bf16):
    x = x_ref[...]
    w = w_ref[...]
    if use_bf16:
        x = x.astype(jnp.bfloat16)
        w = w.astype(jnp.bfloat16)
    o_ref[...] = (jnp.dot(x, w, preferred_element_type=jnp.float32)
                  + b_ref[...])


def matmul_bias_pallas(x, w_t, bias, *, tile_m=512):
    """x: (M, K) f32, w_t: (K, N) f32, bias: (N,) f32 -> (M, N) f32."""
    M, K = x.shape
    N = w_t.shape[1]
    tm = min(tile_m, _round_up(M, 8))
    Mp = _round_up(M, tm)
    if Mp != M:
        x = jnp.pad(x, ((0, Mp - M), (0, 0)))
    out = pl.pallas_call(
        functools.partial(_matmul_bias_kernel, use_bf16=USE_BF16_MATMUL),
        out_shape=jax.ShapeDtypeStruct((Mp, N), jnp.float32),
        grid_spec=pltpu.PrefetchScalarGridSpec(
            num_scalar_prefetch=0,
            grid=(Mp // tm,),
            in_specs=[
                pl.BlockSpec((tm, K), lambda i: (i, 0)),   # activations tile
                pl.BlockSpec((K, N), lambda i: (0, 0)),    # weights (resident)
                pl.BlockSpec((1, N), lambda i: (0, 0)),    # bias
            ],
            out_specs=pl.BlockSpec((tm, N), lambda i: (i, 0)),
        ),
        compiler_params=pltpu.CompilerParams(
            dimension_semantics=("parallel",)),
    )(x, w_t, bias[None, :])
    return out[:M]


# ---------------------------------------------------------------------------
# LSTM recurrence kernel: whole sequence in one pallas_call (no time grid).
# Per step only the recurrent matmul  h @ W_hh^T  is done; the x-projection
# (including both biases) is already in xg_ref.
# ---------------------------------------------------------------------------
def _lstm_recurrence_kernel(xg_ref, h0_ref, c0_ref, whh_ref,
                            y_ref, hn_ref, cn_ref, *, unroll):
    T = xg_ref.shape[0]
    Hp = h0_ref.shape[-1]

    def step(t, carry):
        h, c = carry
        gates = xg_ref[t] + jnp.dot(h, whh_ref[...],
                                    preferred_element_type=jnp.float32)
        # 128-lane-aligned slices (Hp is a multiple of 128) -> no lane shuffles.
        i = jax.nn.sigmoid(gates[:, 0 * Hp:1 * Hp])
        f = jax.nn.sigmoid(gates[:, 1 * Hp:2 * Hp])
        g = jnp.tanh(gates[:, 2 * Hp:3 * Hp])
        o = jax.nn.sigmoid(gates[:, 3 * Hp:4 * Hp])
        c = f * c + i * g
        h = o * jnp.tanh(c)
        y_ref[t] = h
        return h, c

    h_fin, c_fin = lax.fori_loop(0, T, step,
                                 (h0_ref[...], c0_ref[...]), unroll=unroll)
    # Final state written exactly once (not every step).
    hn_ref[...] = h_fin
    cn_ref[...] = c_fin


def lstm_recurrence_pallas(xg, h0p, c0p, whh_t_p):
    """xg: (T, Bp, 4Hp), h0p/c0p: (Bp, Hp), whh_t_p: (Hp, 4Hp)."""
    T, Bp, _ = xg.shape
    Hp = h0p.shape[-1]
    unroll = True if T <= 32 else 8

    def vmem():
        return pl.BlockSpec(memory_space=pltpu.MemorySpace.VMEM)

    return pl.pallas_call(
        functools.partial(_lstm_recurrence_kernel, unroll=unroll),
        out_shape=(jax.ShapeDtypeStruct((T, Bp, Hp), jnp.float32),
                   jax.ShapeDtypeStruct((Bp, Hp), jnp.float32),
                   jax.ShapeDtypeStruct((Bp, Hp), jnp.float32)),
        in_specs=[vmem(), vmem(), vmem(), vmem()],
        out_specs=(vmem(), vmem(), vmem()),
    )(xg, h0p, c0p, whh_t_p)


# ---------------------------------------------------------------------------
# Parameter padding helpers (PyTorch gate layout [i, f, g, o]).
# Padded gate rows / hidden columns are zero => padded hidden lanes stay 0 for
# real batch rows and never influence the real lanes.
# ---------------------------------------------------------------------------
def _pad_gates_axis0(w, H, Hp):
    """(4H, ...) -> (4Hp, ...), zero-padding each of the 4 gate blocks."""
    rest = w.shape[1:]
    w4 = w.reshape((4, H) + rest)
    pad = [(0, 0), (0, Hp - H)] + [(0, 0)] * len(rest)
    return jnp.pad(w4, pad).reshape((4 * Hp,) + rest)


def _prep_layer_params(w_ih, w_hh, b_ih, b_hh, H, Hp, pad_input_cols):
    w_ih_p = _pad_gates_axis0(w_ih, H, Hp)               # (4Hp, Din)
    if pad_input_cols:                                    # layers >= 1: Din=H -> Hp
        w_ih_p = jnp.pad(w_ih_p, ((0, 0), (0, Hp - w_ih.shape[1])))
    w_hh_p = _pad_gates_axis0(w_hh, H, Hp)               # (4Hp, H)
    w_hh_p = jnp.pad(w_hh_p, ((0, 0), (0, Hp - H)))      # (4Hp, Hp)
    bias_p = _pad_gates_axis0(b_ih + b_hh, H, Hp)        # (4Hp,)
    return jnp.transpose(w_ih_p), jnp.transpose(w_hh_p), bias_p


# ------------------------------- Model wrapper -------------------------------
@jax.jit
def lstm_model_forward(x, h0, c0, lstm_weights, fc_w, fc_b):
    """Equivalent of LSTMModel.forward(x, (h0, c0)).

    x  : (B, T, input_dim)  batch_first
    h0 : (L, B, H), c0 : (L, B, H)
    lstm_weights: tuple per layer of (w_ih, w_hh, b_ih, b_hh) in PyTorch layout
    returns logits (B, T, output_dim), (h_n, c_n) each (L, B, H)
    """
    B, T, _ = x.shape
    _, _, H = h0.shape
    O = fc_w.shape[0]
    Bp = _round_up(B, 8)      # sublane-dense batch
    Hp = _round_up(H, 128)    # lane-dense hidden
    Op = _round_up(O, 128)    # lane-dense FC output

    inp = jnp.transpose(x, (1, 0, 2))                         # (T, B, Din) time-major
    inp = jnp.pad(inp, ((0, 0), (0, Bp - B), (0, 0)))         # (T, Bp, Din)
    h0p = jnp.pad(h0, ((0, 0), (0, Bp - B), (0, Hp - H)))
    c0p = jnp.pad(c0, ((0, 0), (0, Bp - B), (0, Hp - H)))

    h_fin, c_fin = [], []
    for layer, (w_ih, w_hh, b_ih, b_hh) in enumerate(lstm_weights):
        wih_t_p, whh_t_p, bias_p = _prep_layer_params(
            w_ih, w_hh, b_ih, b_hh, H, Hp, pad_input_cols=(layer > 0))
        Dcur = inp.shape[-1]
        # Hoisted input projection: ONE (T*Bp, D) x (D, 4Hp) matmul.
        xg = matmul_bias_pallas(inp.reshape(T * Bp, Dcur), wih_t_p, bias_p)
        xg = xg.reshape(T, Bp, 4 * Hp)
        # Sequential recurrence, state resident across all T steps.
        inp, hn, cn = lstm_recurrence_pallas(xg, h0p[layer], c0p[layer], whh_t_p)
        h_fin.append(hn[:B, :H])
        c_fin.append(cn[:B, :H])

    # FC head over the whole (T*Bp, Hp) activation slab, lane-padded output.
    fc_wt_p = jnp.pad(jnp.transpose(fc_w), ((0, Hp - H), (0, Op - O)))  # (Hp, Op)
    fc_b_p = jnp.pad(fc_b, (0, Op - O))
    logits_p = matmul_bias_pallas(inp.reshape(T * Bp, Hp), fc_wt_p, fc_b_p)
    logits = jnp.transpose(logits_p.reshape(T, Bp, Op), (1, 0, 2))[:B, :, :O]
    return logits, (jnp.stack(h_fin, 0), jnp.stack(c_fin, 0))


# ------------------------------ Pure-JAX reference ----------------------------
def reference_forward(x, h0, c0, lstm_weights, fc_w, fc_b):
    B, T, _ = x.shape
    inp = x
    hs, cs = [], []
    for layer, (w_ih, w_hh, b_ih, b_hh) in enumerate(lstm_weights):
        H = w_hh.shape[1]
        h, c = h0[layer], c0[layer]
        outs = []
        for t in range(T):
            g = inp[:, t] @ w_ih.T + b_ih + h @ w_hh.T + b_hh
            i = jax.nn.sigmoid(g[:, :H])
            f = jax.nn.sigmoid(g[:, H:2 * H])
            gg = jnp.tanh(g[:, 2 * H:3 * H])
            o = jax.nn.sigmoid(g[:, 3 * H:])
            c = f * c + i * gg
            h = o * jnp.tanh(c)
            outs.append(h)
        inp = jnp.stack(outs, axis=1)
        hs.append(h)
        cs.append(c)
    logits = inp @ fc_w.T + fc_b
    return logits, (jnp.stack(hs, 0), jnp.stack(cs, 0))


# ----------------------------------- Main -------------------------------------
if __name__ == "__main__":
    batch, seq = 2, 8
    input_dim, hidden_dim, output_dim, num_layers = 16, 32, 8, 2

    key = jax.random.PRNGKey(0)
    keys = iter(jax.random.split(key, 4 * num_layers + 6))
    scale = 1.0 / jnp.sqrt(hidden_dim)

    # Deterministic synthetic parameters (PyTorch nn.LSTM layout).
    lstm_weights = []
    for layer in range(num_layers):
        d_in = input_dim if layer == 0 else hidden_dim
        w_ih = jax.random.uniform(next(keys), (4 * hidden_dim, d_in),
                                  minval=-scale, maxval=scale, dtype=jnp.float32)
        w_hh = jax.random.uniform(next(keys), (4 * hidden_dim, hidden_dim),
                                  minval=-scale, maxval=scale, dtype=jnp.float32)
        b_ih = jax.random.uniform(next(keys), (4 * hidden_dim,),
                                  minval=-scale, maxval=scale, dtype=jnp.float32)
        b_hh = jax.random.uniform(next(keys), (4 * hidden_dim,),
                                  minval=-scale, maxval=scale, dtype=jnp.float32)
        lstm_weights.append((w_ih, w_hh, b_ih, b_hh))
    lstm_weights = tuple(lstm_weights)

    fc_w = jax.random.uniform(next(keys), (output_dim, hidden_dim),
                              minval=-scale, maxval=scale, dtype=jnp.float32)
    fc_b = jax.random.uniform(next(keys), (output_dim,),
                              minval=-scale, maxval=scale, dtype=jnp.float32)

    # Inputs.
    x = jax.random.normal(next(keys), (batch, seq, input_dim), dtype=jnp.float32)
    h0 = jax.random.normal(next(keys), (num_layers, batch, hidden_dim),
                           dtype=jnp.float32)
    c0 = jax.random.normal(next(keys), (num_layers, batch, hidden_dim),
                           dtype=jnp.float32)

    logits, (h_n, c_n) = lstm_model_forward(x, h0, c0, lstm_weights, fc_w, fc_b)
    jax.block_until_ready((logits, h_n, c_n))

    ref_logits, (ref_h, ref_c) = reference_forward(x, h0, c0, lstm_weights,
                                                   fc_w, fc_b)
    assert logits.shape == (batch, seq, output_dim)
    assert h_n.shape == (num_layers, batch, hidden_dim)
    assert c_n.shape == (num_layers, batch, hidden_dim)
    assert jnp.allclose(logits, ref_logits, atol=1e-4, rtol=1e-4)
    assert jnp.allclose(h_n, ref_h, atol=1e-4, rtol=1e-4)
    assert jnp.allclose(c_n, ref_c, atol=1e-4, rtol=1e-4)

    print("KERNEL_OK")
</pallas_src>

<mosaic_0001>
module attributes {stable_mosaic.version = 11 : i64} {
  func.func @_matmul_bias_kernel(%arg0: i32, %arg1: memref<64x16xf32, #tpu.memory_space<vmem>>, %arg2: memref<16x512xf32, #tpu.memory_space<vmem>>, %arg3: memref<1x512xf32, #tpu.memory_space<vmem>>, %arg4: memref<64x512xf32, #tpu.memory_space<vmem>>) attributes {dimension_semantics = [#tpu.dimension_semantics<parallel>], iteration_bounds = array<i64: 1>, scalar_prefetch = 0 : i64, scratch_operands = 0 : i64, tpu.core_type = #tpu.core_type<tc>, window_params = [{transform_indices = @transform_0, window_bounds = array<i64: 64, 16>}, {pipeline_mode = #tpu.pipeline_mode<synchronous>, transform_indices = @transform_1, window_bounds = array<i64: 16, 512>}, {pipeline_mode = #tpu.pipeline_mode<synchronous>, transform_indices = @transform_2, window_bounds = array<i64: 1, 512>}, {transform_indices = @transform_3, window_bounds = array<i64: 64, 512>}]} {
    %c0 = arith.constant 0 : index
    %c0_0 = arith.constant 0 : index
    %0 = vector.load %arg1[%c0, %c0_0] : memref<64x16xf32, #tpu.memory_space<vmem>>, vector<64x16xf32>
    %c0_1 = arith.constant 0 : index
    %c0_2 = arith.constant 0 : index
    %1 = vector.load %arg2[%c0_1, %c0_2] : memref<16x512xf32, #tpu.memory_space<vmem>>, vector<16x512xf32>
    %cst = arith.constant dense<0.000000e+00> : vector<64x512xf32>
    %2 = tpu.matmul %0, %1, %cst {dimension_numbers = #tpu.dot_dimension_numbers<[1], [0], [0], [1], [0, 0, 1, 1], [], []>} : vector<64x16xf32>, vector<16x512xf32>, vector<64x512xf32> -> vector<64x512xf32>
    %c0_3 = arith.constant 0 : index
    %c0_4 = arith.constant 0 : index
    %3 = vector.load %arg3[%c0_3, %c0_4] : memref<1x512xf32, #tpu.memory_space<vmem>>, vector<1x512xf32>
    %4 = vector.broadcast %3 : vector<1x512xf32> to vector<64x512xf32>
    %5 = arith.addf %2, %4 : vector<64x512xf32>
    %c0_5 = arith.constant 0 : index
    %c0_6 = arith.constant 0 : index
    %6 = vector.load %arg4[%c0_5, %c0_6] : memref<64x512xf32, #tpu.memory_space<vmem>>, vector<64x512xf32>
    tpu.vector_store %arg4[%c0_5, %c0_6], %5 {strides = array<i32>} : memref<64x512xf32, #tpu.memory_space<vmem>>, vector<64x512xf32>,
    return
  }
  func.func @transform_0(%arg0: i32) -> (i32, i32) {
    %c0_i32 = arith.constant 0 : i32
    %c0_i32_0 = arith.constant 0 : i32
    return %arg0, %c0_i32 : i32, i32
  }
  func.func @transform_1(%arg0: i32) -> (i32, i32) {
    %c0_i32 = arith.constant 0 : i32
    %c0_i32_0 = arith.constant 0 : i32
    %c0_i32_1 = arith.constant 0 : i32
    return %c0_i32, %c0_i32_0 : i32, i32
  }
  func.func @transform_2(%arg0: i32) -> (i32, i32) {
    %c0_i32 = arith.constant 0 : i32
    %c0_i32_0 = arith.constant 0 : i32
    %c0_i32_1 = arith.constant 0 : i32
    return %c0_i32, %c0_i32_0 : i32, i32
  }
  func.func @transform_3(%arg0: i32) -> (i32, i32) {
    %c0_i32 = arith.constant 0 : i32
    %c0_i32_0 = arith.constant 0 : i32
    return %arg0, %c0_i32 : i32, i32
  }
}

module attributes {stable_mosaic.version = 11 : i64} {
  func.func @_matmul_bias_kernel(%arg0: i32, %arg1: memref<64x128xf32, #tpu.memory_space<vmem>>, %arg2: memref<128x512xf32, #tpu.memory_space<vmem>>, %arg3: memref<1x512xf32, #tpu.memory_space<vmem>>, %arg4: memref<64x512xf32, #tpu.memory_space<vmem>>) attributes {dimension_semantics = [#tpu.dimension_semantics<parallel>], iteration_bounds = array<i64: 1>, scalar_prefetch = 0 : i64, scratch_operands = 0 : i64, tpu.core_type = #tpu.core_type<tc>, window_params = [{transform_indices = @transform_0, window_bounds = array<i64: 64, 128>}, {pipeline_mode = #tpu.pipeline_mode<synchronous>, transform_indices = @transform_1, window_bounds = array<i64: 128, 512>}, {pipeline_mode = #tpu.pipeline_mode<synchronous>, transform_indices = @transform_2, window_bounds = array<i64: 1, 512>}, {transform_indices = @transform_3, window_bounds = array<i64: 64, 512>}]} {
    %c0 = arith.constant 0 : index
    %c0_0 = arith.constant 0 : index
    %0 = vector.load %arg1[%c0, %c0_0] : memref<64x128xf32, #tpu.memory_space<vmem>>, vector<64x128xf32>
    %c0_1 = arith.constant 0 : index
    %c0_2 = arith.constant 0 : index
    %1 = vector.load %arg2[%c0_1, %c0_2] : memref<128x512xf32, #tpu.memory_space<vmem>>, vector<128x512xf32>
    %cst = arith.constant dense<0.000000e+00> : vector<64x512xf32>
    %2 = tpu.matmul %0, %1, %cst {dimension_numbers = #tpu.dot_dimension_numbers<[1], [0], [0], [1], [0, 0, 1, 1], [], []>} : vector<64x128xf32>, vector<128x512xf32>, vector<64x512xf32> -> vector<64x512xf32>
    %c0_3 = arith.constant 0 : index
    %c0_4 = arith.constant 0 : index
    %3 = vector.load %arg3[%c0_3, %c0_4] : memref<1x512xf32, #tpu.memory_space<vmem>>, vector<1x512xf32>
    %4 = vector.broadcast %3 : vector<1x512xf32> to vector<64x512xf32>
    %5 = arith.addf %2, %4 : vector<64x512xf32>
    %c0_5 = arith.constant 0 : index
    %c0_6 = arith.constant 0 : index
    %6 = vector.load %arg4[%c0_5, %c0_6] : memref<64x512xf32, #tpu.memory_space<vmem>>, vector<64x512xf32>
    tpu.vector_store %arg4[%c0_5, %c0_6], %5 {strides = array<i32>} : memref<64x512xf32, #tpu.memory_space<vmem>>, vector<64x512xf32>,
    return
  }
  func.func @transform_0(%arg0: i32) -> (i32, i32) {
    %c0_i32 = arith.constant 0 : i32
    %c0_i32_0 = arith.constant 0 : i32
    return %arg0, %c0_i32 : i32, i32
  }
  func.func @transform_1(%arg0: i32) -> (i32, i32) {
    %c0_i32 = arith.constant 0 : i32
    %c0_i32_0 = arith.constant 0 : i32
    %c0_i32_1 = arith.constant 0 : i32
    return %c0_i32, %c0_i32_0 : i32, i32
  }
  func.func @transform_2(%arg0: i32) -> (i32, i32) {
    %c0_i32 = arith.constant 0 : i32
    %c0_i32_0 = arith.constant 0 : i32
    %c0_i32_1 = arith.constant 0 : i32
    return %c0_i32, %c0_i32_0 : i32, i32
  }
  func.func @transform_3(%arg0: i32) -> (i32, i32) {
    %c0_i32 = arith.constant 0 : i32
    %c0_i32_0 = arith.constant 0 : i32
    return %arg0, %c0_i32 : i32, i32
  }
}

module attributes {stable_mosaic.version = 11 : i64} {
  func.func @_lstm_recurrence_kernel(%arg0: memref<8x8x512xf32, #tpu.memory_space<vmem>>, %arg1: memref<8x128xf32, #tpu.memory_space<vmem>>, %arg2: memref<8x128xf32, #tpu.memory_space<vmem>>, %arg3: memref<128x512xf32, #tpu.memory_space<vmem>>, %arg4: memref<8x8x128xf32, #tpu.memory_space<vmem>>, %arg5: memref<8x128xf32, #tpu.memory_space<vmem>>, %arg6: memref<8x128xf32, #tpu.memory_space<vmem>>) attributes {dimension_semantics = [], scalar_prefetch = 0 : i64, scratch_operands = 0 : i64, tpu.core_type = #tpu.core_type<tc>} {
    %c0 = arith.constant 0 : index
    %c0_0 = arith.constant 0 : index
    %0 = vector.load %arg1[%c0, %c0_0] : memref<8x128xf32, #tpu.memory_space<vmem>>, vector<8x128xf32>
    %c0_1 = arith.constant 0 : index
    %c0_2 = arith.constant 0 : index
    %1 = vector.load %arg2[%c0_1, %c0_2] : memref<8x128xf32, #tpu.memory_space<vmem>>, vector<8x128xf32>
    %c0_i32 = arith.constant 0 : i32
    %2 = arith.index_cast %c0_i32 : i32 to index
    %c0_3 = arith.constant 0 : index
    %c0_4 = arith.constant 0 : index
    %3 = vector.load %arg0[%2, %c0_3, %c0_4] : memref<8x8x512xf32, #tpu.memory_space<vmem>>, vector<1x8x512xf32>
    %4 = vector.shape_cast %3 : vector<1x8x512xf32> to vector<8x512xf32>
    %c0_5 = arith.constant 0 : index
    %c0_6 = arith.constant 0 : index
    %5 = vector.load %arg3[%c0_5, %c0_6] : memref<128x512xf32, #tpu.memory_space<vmem>>, vector<128x512xf32>
    %cst = arith.constant dense<0.000000e+00> : vector<8x512xf32>
    %6 = tpu.matmul %0, %5, %cst {dimension_numbers = #tpu.dot_dimension_numbers<[1], [0], [0], [1], [0, 0, 1, 1], [], []>} : vector<8x128xf32>, vector<128x512xf32>, vector<8x512xf32> -> vector<8x512xf32>
    %7 = arith.addf %4, %6 : vector<8x512xf32>
    %8 = vector.extract_strided_slice %7 {offsets = [0, 0], sizes = [8, 128], strides = [1, 1]} : vector<8x512xf32> to vector<8x128xf32>
    %9 = arith.negf %8 : vector<8x128xf32>
    %10 = math.exp %9 : vector<8x128xf32>
    %cst_7 = arith.constant 1.000000e+00 : f32
    %11 = vector.broadcast %cst_7 : f32 to vector<8x128xf32>
    %12 = arith.addf %11, %10 : vector<8x128xf32>
    %13 = arith.divf %11, %12 : vector<8x128xf32>
    %14 = vector.extract_strided_slice %7 {offsets = [0, 128], sizes = [8, 128], strides = [1, 1]} : vector<8x512xf32> to vector<8x128xf32>
    %15 = arith.negf %14 : vector<8x128xf32>
    %16 = math.exp %15 : vector<8x128xf32>
    %cst_8 = arith.constant 1.000000e+00 : f32
    %17 = vector.broadcast %cst_8 : f32 to vector<8x128xf32>
    %18 = arith.addf %17, %16 : vector<8x128xf32>
    %19 = arith.divf %17, %18 : vector<8x128xf32>
    %20 = vector.extract_strided_slice %7 {offsets = [0, 256], sizes = [8, 128], strides = [1, 1]} : vector<8x512xf32> to vector<8x128xf32>
    %21 = math.tanh %20 : vector<8x128xf32>
    %22 = vector.extract_strided_slice %7 {offsets = [0, 384], sizes = [8, 128], strides = [1, 1]} : vector<8x512xf32> to vector<8x128xf32>
    %23 = arith.negf %22 : vector<8x128xf32>
    %24 = math.exp %23 : vector<8x128xf32>
    %cst_9 = arith.constant 1.000000e+00 : f32
    %25 = vector.broadcast %cst_9 : f32 to vector<8x128xf32>
    %26 = arith.addf %25, %24 : vector<8x128xf32>
    %27 = arith.divf %25, %26 : vector<8x128xf32>
    %28 = arith.mulf %19, %1 : vector<8x128xf32>
    %29 = arith.mulf %13, %21 : vector<8x128xf32>
    %30 = arith.addf %28, %29 : vector<8x128xf32>
    %31 = math.tanh %30 : vector<8x128xf32>
    %32 = arith.mulf %27, %31 : vector<8x128xf32>
    %33 = arith.index_cast %c0_i32 : i32 to index
    %c0_10 = arith.constant 0 : index
    %c0_11 = arith.constant 0 : index
    %34 = vector.load %arg4[%33, %c0_10, %c0_11] : memref<8x8x128xf32, #tpu.memory_space<vmem>>, vector<1x8x128xf32>
    %35 = vector.shape_cast %34 : vector<1x8x128xf32> to vector<8x128xf32>
    %36 = vector.shape_cast %32 : vector<8x128xf32> to vector<1x8x128xf32>
    tpu.vector_store %arg4[%33, %c0_10, %c0_11], %36 {strides = array<i32>} : memref<8x8x128xf32, #tpu.memory_space<vmem>>, vector<1x8x128xf32>,
    %c1_i32 = arith.constant 1 : i32
    %37 = arith.index_cast %c1_i32 : i32 to index
    %c0_12 = arith.constant 0 : index
    %c0_13 = arith.constant 0 : index
    %38 = vector.load %arg0[%37, %c0_12, %c0_13] : memref<8x8x512xf32, #tpu.memory_space<vmem>>, vector<1x8x512xf32>
    %39 = vector.shape_cast %38 : vector<1x8x512xf32> to vector<8x512xf32>
    %c0_14 = arith.constant 0 : index
    %c0_15 = arith.constant 0 : index
    %40 = vector.load %arg3[%c0_14, %c0_15] : memref<128x512xf32, #tpu.memory_space<vmem>>, vector<128x512xf32>
    %cst_16 = arith.constant dense<0.000000e+00> : vector<8x512xf32>
    %41 = tpu.matmul %32, %40, %cst_16 {dimension_numbers = #tpu.dot_dimension_numbers<[1], [0], [0], [1], [0, 0, 1, 1], [], []>} : vector<8x128xf32>, vector<128x512xf32>, vector<8x512xf32> -> vector<8x512xf32>
    %42 = arith.addf %39, %41 : vector<8x512xf32>
    %43 = vector.extract_strided_slice %42 {offsets = [0, 0], sizes = [8, 128], strides = [1, 1]} : vector<8x512xf32> to vector<8x128xf32>
    %44 = arith.negf %43 : vector<8x128xf32>
    %45 = math.exp %44 : vector<8x128xf32>
    %cst_17 = arith.constant 1.000000e+00 : f32
    %46 = vector.broadcast %cst_17 : f32 to vector<8x128xf32>
    %47 = arith.addf %46, %45 : vector<8x128xf32>
    %48 = arith.divf %46, %47 : vector<8x128xf32>
    %49 = vector.extract_strided_slice %42 {offsets = [0, 128], sizes = [8, 128], strides = [1, 1]} : vector<8x512xf32> to vector<8x128xf32>
    %50 = arith.negf %49 : vector<8x128xf32>
    %51 = math.exp %50 : vector<8x128xf32>
    %cst_18 = arith.constant 1.000000e+00 : f32
    %52 = vector.broadcast %cst_18 : f32 to vector<8x128xf32>
    %53 = arith.addf %52, %51 : vector<8x128xf32>
    %54 = arith.divf %52, %53 : vector<8x128xf32>
    %55 = vector.extract_strided_slice %42 {offsets = [0, 256], sizes = [8, 128], strides = [1, 1]} : vector<8x512xf32> to vector<8x128xf32>
    %56 = math.tanh %55 : vector<8x128xf32>
    %57 = vector.extract_strided_slice %42 {offsets = [0, 384], sizes = [8, 128], strides = [1, 1]} : vector<8x512xf32> to vector<8x128xf32>
    %58 = arith.negf %57 : vector<8x128xf32>
    %59 = math.exp %58 : vector<8x128xf32>
    %cst_19 = arith.constant 1.000000e+00 : f32
    %60 = vector.broadcast %cst_19 : f32 to vector<8x128xf32>
    %61 = arith.addf %60, %59 : vector<8x128xf32>
    %62 = arith.divf %60, %61 : vector<8x128xf32>
    %63 = arith.mulf %54, %30 : vector<8x128xf32>
    %64 = arith.mulf %48, %56 : vector<8x128xf32>
    %65 = arith.addf %63, %64 : vector<8x128xf32>
    %66 = math.tanh %65 : vector<8x128xf32>
    %67 = arith.mulf %62, %66 : vector<8x128xf32>
    %68 = arith.index_cast %c1_i32 : i32 to index
    %c0_20 = arith.constant 0 : index
    %c0_21 = arith.constant 0 : index
    %69 = vector.load %arg4[%68, %c0_20, %c0_21] : memref<8x8x128xf32, #tpu.memory_space<vmem>>, vector<1x8x128xf32>
    %70 = vector.shape_cast %69 : vector<1x8x128xf32> to vector<8x128xf32>
    %71 = vector.shape_cast %67 : vector<8x128xf32> to vector<1x8x128xf32>
    tpu.vector_store %arg4[%68, %c0_20, %c0_21], %71 {strides = array<i32>} : memref<8x8x128xf32, #tpu.memory_space<vmem>>, vector<1x8x128xf32>,
    %c2_i32 = arith.constant 2 : i32
    %72 = arith.index_cast %c2_i32 : i32 to index
    %c0_22 = arith.constant 0 : index
    %c0_23 = arith.constant 0 : index
    %73 = vector.load %arg0[%72, %c0_22, %c0_23] : memref<8x8x512xf32, #tpu.memory_space<vmem>>, vector<1x8x512xf32>
    %74 = vector.shape_cast %73 : vector<1x8x512xf32> to vector<8x512xf32>
    %c0_24 = arith.constant 0 : index
    %c0_25 = arith.constant 0 : index
    %75 = vector.load %arg3[%c0_24, %c0_25] : memref<128x512xf32, #tpu.memory_space<vmem>>, vector<128x512xf32>
    %cst_26 = arith.constant dense<0.000000e+00> : vector<8x512xf32>
    %76 = tpu.matmul %67, %75, %cst_26 {dimension_numbers = #tpu.dot_dimension_numbers<[1], [0], [0], [1], [0, 0, 1, 1], [], []>} : vector<8x128xf32>, vector<128x512xf32>, vector<8x512xf32> -> vector<8x512xf32>
    %77 = arith.addf %74, %76 : vector<8x512xf32>
    %78 = vector.extract_strided_slice %77 {offsets = [0, 0], sizes = [8, 128], strides = [1, 1]} : vector<8x512xf32> to vector<8x128xf32>
    %79 = arith.negf %78 : vector<8x128xf32>
    %80 = math.exp %79 : vector<8x128xf32>
    %cst_27 = arith.constant 1.000000e+00 : f32
    %81 = vector.broadcast %cst_27 : f32 to vector<8x128xf32>
    %82 = arith.addf %81, %80 : vector<8x128xf32>
    %83 = arith.divf %81, %82 : vector<8x128xf32>
    %84 = vector.extract_strided_slice %77 {offsets = [0, 128], sizes = [8, 128], strides = [1, 1]} : vector<8x512xf32> to vector<8x128xf32>
    %85 = arith.negf %84 : vector<8x128xf32>
    %86 = math.exp %85 : vector<8x128xf32>
    %cst_28 = arith.constant 1.000000e+00 : f32
    %87 = vector.broadcast %cst_28 : f32 to vector<8x128xf32>
    %88 = arith.addf %87, %86 : vector<8x128xf32>
    %89 = arith.divf %87, %88 : vector<8x128xf32>
    %90 = vector.extract_strided_slice %77 {offsets = [0, 256], sizes = [8, 128], strides = [1, 1]} : vector<8x512xf32> to vector<8x128xf32>
    %91 = math.tanh %90 : vector<8x128xf32>
    %92 = vector.extract_strided_slice %77 {offsets = [0, 384], sizes = [8, 128], strides = [1, 1]} : vector<8x512xf32> to vector<8x128xf32>
    %93 = arith.negf %92 : vector<8x128xf32>
    %94 = math.exp %93 : vector<8x128xf32>
    %cst_29 = arith.constant 1.000000e+00 : f32
    %95 = vector.broadcast %cst_29 : f32 to vector<8x128xf32>
    %96 = arith.addf %95, %94 : vector<8x128xf32>
    %97 = arith.divf %95, %96 : vector<8x128xf32>
    %98 = arith.mulf %89, %65 : vector<8x128xf32>
    %99 = arith.mulf %83, %91 : vector<8x128xf32>
    %100 = arith.addf %98, %99 : vector<8x128xf32>
    %101 = math.tanh %100 : vector<8x128xf32>
    %102 = arith.mulf %97, %101 : vector<8x128xf32>
    %103 = arith.index_cast %c2_i32 : i32 to index
    %c0_30 = arith.constant 0 : index
    %c0_31 = arith.constant 0 : index
    %104 = vector.load %arg4[%103, %c0_30, %c0_31] : memref<8x8x128xf32, #tpu.memory_space<vmem>>, vector<1x8x128xf32>
    %105 = vector.shape_cast %104 : vector<1x8x128xf32> to vector<8x128xf32>
    %106 = vector.shape_cast %102 : vector<8x128xf32> to vector<1x8x128xf32>
    tpu.vector_store %arg4[%103, %c0_30, %c0_31], %106 {strides = array<i32>} : memref<8x8x128xf32, #tpu.memory_space<vmem>>, vector<1x8x128xf32>,
    %c3_i32 = arith.constant 3 : i32
    %107 = arith.index_cast %c3_i32 : i32 to index
    %c0_32 = arith.constant 0 : index
    %c0_33 = arith.constant 0 : index
    %108 = vector.load %arg0[%107, %c0_32, %c0_33] : memref<8x8x512xf32, #tpu.memory_space<vmem>>, vector<1x8x512xf32>
    %109 = vector.shape_cast %108 : vector<1x8x512xf32> to vector<8x512xf32>
    %c0_34 = arith.constant 0 : index
    %c0_35 = arith.constant 0 : index
    %110 = vector.load %arg3[%c0_34, %c0_35] : memref<128x512xf32, #tpu.memory_space<vmem>>, vector<128x512xf32>
    %cst_36 = arith.constant dense<0.000000e+00> : vector<8x512xf32>
    %111 = tpu.matmul %102, %110, %cst_36 {dimension_numbers = #tpu.dot_dimension_numbers<[1], [0], [0], [1], [0, 0, 1, 1], [], []>} : vector<8x128xf32>, vector<128x512xf32>, vector<8x512xf32> -> vector<8x512xf32>
    %112 = arith.addf %109, %111 : vector<8x512xf32>
    %113 = vector.extract_strided_slice %112 {offsets = [0, 0], sizes = [8, 128], strides = [1, 1]} : vector<8x512xf32> to vector<8x128xf32>
    %114 = arith.negf %113 : vector<8x128xf32>
    %115 = math.exp %114 : vector<8x128xf32>
    %cst_37 = arith.constant 1.000000e+00 : f32
    %116 = vector.broadcast %cst_37 : f32 to vector<8x128xf32>
    %117 = arith.addf %116, %115 : vector<8x128xf32>
    %118 = arith.divf %116, %117 : vector<8x128xf32>
    %119 = vector.extract_strided_slice %112 {offsets = [0, 128], sizes = [8, 128], strides = [1, 1]} : vector<8x512xf32> to vector<8x128xf32>
    %120 = arith.negf %119 : vector<8x128xf32>
    %121 = math.exp %120 : vector<8x128xf32>
    %cst_38 = arith.constant 1.000000e+00 : f32
    %122 = vector.broadcast %cst_38 : f32 to vector<8x128xf32>
    %123 = arith.addf %122, %121 : vector<8x128xf32>
    %124 = arith.divf %122, %123 : vector<8x128xf32>
    %125 = vector.extract_strided_slice %112 {offsets = [0, 256], sizes = [8, 128], strides = [1, 1]} : vector<8x512xf32> to vector<8x128xf32>
    %126 = math.tanh %125 : vector<8x128xf32>
    %127 = vector.extract_strided_slice %112 {offsets = [0, 384], sizes = [8, 128], strides = [1, 1]} : vector<8x512xf32> to vector<8x128xf32>
    %128 = arith.negf %127 : vector<8x128xf32>
    %129 = math.exp %128 : vector<8x128xf32>
    %cst_39 = arith.constant 1.000000e+00 : f32
    %130 = vector.broadcast %cst_39 : f32 to vector<8x128xf32>
    %131 = arith.addf %130, %129 : vector<8x128xf32>
    %132 = arith.divf %130, %131 : vector<8x128xf32>
    %133 = arith.mulf %124, %100 : vector<8x128xf32>
    %134 = arith.mulf %118, %126 : vector<8x128xf32>
    %135 = arith.addf %133, %134 : vector<8x128xf32>
    %136 = math.tanh %135 : vector<8x128xf32>
    %137 = arith.mulf %132, %136 : vector<8x128xf32>
    %138 = arith.index_cast %c3_i32 : i32 to index
    %c0_40 = arith.constant 0 : index
    %c0_41 = arith.constant 0 : index
    %139 = vector.load %arg4[%138, %c0_40, %c0_41] : memref<8x8x128xf32, #tpu.memory_space<vmem>>, vector<1x8x128xf32>
    %140 = vector.shape_cast %139 : vector<1x8x128xf32> to vector<8x128xf32>
    %141 = vector.shape_cast %137 : vector<8x128xf32> to vector<1x8x128xf32>
    tpu.vector_store %arg4[%138, %c0_40, %c0_41], %141 {strides = array<i32>} : memref<8x8x128xf32, #tpu.memory_space<vmem>>, vector<1x8x128xf32>,
    %c4_i32 = arith.constant 4 : i32
    %142 = arith.index_cast %c4_i32 : i32 to index
    %c0_42 = arith.constant 0 : index
    %c0_43 = arith.constant 0 : index
    %143 = vector.load %arg0[%142, %c0_42, %c0_43] : memref<8x8x512xf32, #tpu.memory_space<vmem>>, vector<1x8x512xf32>
    %144 = vector.shape_cast %143 : vector<1x8x512xf32> to vector<8x512xf32>
    %c0_44 = arith.constant 0 : index
    %c0_45 = arith.constant 0 : index
    %145 = vector.load %arg3[%c0_44, %c0_45] : memref<128x512xf32, #tpu.memory_space<vmem>>, vector<128x512xf32>
    %cst_46 = arith.constant dense<0.000000e+00> : vector<8x512xf32>
    %146 = tpu.matmul %137, %145, %cst_46 {dimension_numbers = #tpu.dot_dimension_numbers<[1], [0], [0], [1], [0, 0, 1, 1], [], []>} : vector<8x128xf32>, vector<128x512xf32>, vector<8x512xf32> -> vector<8x512xf32>
    %147 = arith.addf %144, %146 : vector<8x512xf32>
    %148 = vector.extract_strided_slice %147 {offsets = [0, 0], sizes = [8, 128], strides = [1, 1]} : vector<8x512xf32> to vector<8x128xf32>
    %149 = arith.negf %148 : vector<8x128xf32>
    %150 = math.exp %149 : vector<8x128xf32>
    %cst_47 = arith.constant 1.000000e+00 : f32
    %151 = vector.broadcast %cst_47 : f32 to vector<8x128xf32>
    %152 = arith.addf %151, %150 : vector<8x128xf32>
    %153 = arith.divf %151, %152 : vector<8x128xf32>
    %154 = vector.extract_strided_slice %147 {offsets = [0, 128], sizes = [8, 128], strides = [1, 1]} : vector<8x512xf32> to vector<8x128xf32>
    %155 = arith.negf %154 : vector<8x128xf32>
    %156 = math.exp %155 : vector<8x128xf32>
    %cst_48 = arith.constant 1.000000e+00 : f32
    %157 = vector.broadcast %cst_48 : f32 to vector<8x128xf32>
    %158 = arith.addf %157, %156 : vector<8x128xf32>
    %159 = arith.divf %157, %158 : vector<8x128xf32>
    %160 = vector.extract_strided_slice %147 {offsets = [0, 256], sizes = [8, 128], strides = [1, 1]} : vector<8x512xf32> to vector<8x128xf32>
    %161 = math.tanh %160 : vector<8x128xf32>
    %162 = vector.extract_strided_slice %147 {offsets = [0, 384], sizes = [8, 128], strides = [1, 1]} : vector<8x512xf32> to vector<8x128xf32>
    %163 = arith.negf %162 : vector<8x128xf32>
    %164 = math.exp %163 : vector<8x128xf32>
    %cst_49 = arith.constant 1.000000e+00 : f32
    %165 = vector.broadcast %cst_49 : f32 to vector<8x128xf32>
    %166 = arith.addf %165, %164 : vector<8x128xf32>
    %167 = arith.divf %165, %166 : vector<8x128xf32>
    %168 = arith.mulf %159, %135 : vector<8x128xf32>
    %169 = arith.mulf %153, %161 : vector<8x128xf32>
    %170 = arith.addf %168, %169 : vector<8x128xf32>
    %171 = math.tanh %170 : vector<8x128xf32>
    %172 = arith.mulf %167, %171 : vector<8x128xf32>
    %173 = arith.index_cast %c4_i32 : i32 to index
    %c0_50 = arith.constant 0 : index
    %c0_51 = arith.constant 0 : index
    %174 = vector.load %arg4[%173, %c0_50, %c0_51] : memref<8x8x128xf32, #tpu.memory_space<vmem>>, vector<1x8x128xf32>
    %175 = vector.shape_cast %174 : vector<1x8x128xf32> to vector<8x128xf32>
    %176 = vector.shape_cast %172 : vector<8x128xf32> to vector<1x8x128xf32>
    tpu.vector_store %arg4[%173, %c0_50, %c0_51], %176 {strides = array<i32>} : memref<8x8x128xf32, #tpu.memory_space<vmem>>, vector<1x8x128xf32>,
    %c5_i32 = arith.constant 5 : i32
    %177 = arith.index_cast %c5_i32 : i32 to index
    %c0_52 = arith.constant 0 : index
    %c0_53 = arith.constant 0 : index
    %178 = vector.load %arg0[%177, %c0_52, %c0_53] : memref<8x8x512xf32, #tpu.memory_space<vmem>>, vector<1x8x512xf32>
    %179 = vector.shape_cast %178 : vector<1x8x512xf32> to vector<8x512xf32>
    %c0_54 = arith.constant 0 : index
    %c0_55 = arith.constant 0 : index
    %180 = vector.load %arg3[%c0_54, %c0_55] : memref<128x512xf32, #tpu.memory_space<vmem>>, vector<128x512xf32>
    %cst_56 = arith.constant dense<0.000000e+00> : vector<8x512xf32>
    %181 = tpu.matmul %172, %180, %cst_56 {dimension_numbers = #tpu.dot_dimension_numbers<[1], [0], [0], [1], [0, 0, 1, 1], [], []>} : vector<8x128xf32>, vector<128x512xf32>, vector<8x512xf32> -> vector<8x512xf32>
    %182 = arith.addf %179, %181 : vector<8x512xf32>
    %183 = vector.extract_strided_slice %182 {offsets = [0, 0], sizes = [8, 128], strides = [1, 1]} : vector<8x512xf32> to vector<8x128xf32>
    %184 = arith.negf %183 : vector<8x128xf32>
    %185 = math.exp %184 : vector<8x128xf32>
    %cst_57 = arith.constant 1.000000e+00 : f32
    %186 = vector.broadcast %cst_57 : f32 to vector<8x128xf32>
    %187 = arith.addf %186, %185 : vector<8x128xf32>
    %188 = arith.divf %186, %187 : vector<8x128xf32>
    %189 = vector.extract_strided_slice %182 {offsets = [0, 128], sizes = [8, 128], strides = [1, 1]} : vector<8x512xf32> to vector<8x128xf32>
    %190 = arith.negf %189 : vector<8x128xf32>
    %191 = math.exp %190 : vector<8x128xf32>
    %cst_58 = arith.constant 1.000000e+00 : f32
    %192 = vector.broadcast %cst_58 : f32 to vector<8x128xf32>
    %193 = arith.addf %192, %191 : vector<8x128xf32>
    %194 = arith.divf %192, %193 : vector<8x128xf32>
    %195 = vector.extract_strided_slice %182 {offsets = [0, 256], sizes = [8, 128], strides = [1, 1]} : vector<8x512xf32> to vector<8x128xf32>
    %196 = math.tanh %195 : vector<8x128xf32>
    %197 = vector.extract_strided_slice %182 {offsets = [0, 384], sizes = [8, 128], strides = [1, 1]} : vector<8x512xf32> to vector<8x128xf32>
    %198 = arith.negf %197 : vector<8x128xf32>
    %199 = math.exp %198 : vector<8x128xf32>
    %cst_59 = arith.constant 1.000000e+00 : f32
    %200 = vector.broadcast %cst_59 : f32 to vector<8x128xf32>
    %201 = arith.addf %200, %199 : vector<8x128xf32>
    %202 = arith.divf %200, %201 : vector<8x128xf32>
    %203 = arith.mulf %194, %170 : vector<8x128xf32>
    %204 = arith.mulf %188, %196 : vector<8x128xf32>
    %205 = arith.addf %203, %204 : vector<8x128xf32>
    %206 = math.tanh %205 : vector<8x128xf32>
    %207 = arith.mulf %202, %206 : vector<8x128xf32>
    %208 = arith.index_cast %c5_i32 : i32 to index
    %c0_60 = arith.constant 0 : index
    %c0_61 = arith.constant 0 : index
    %209 = vector.load %arg4[%208, %c0_60, %c0_61] : memref<8x8x128xf32, #tpu.memory_space<vmem>>, vector<1x8x128xf32>
    %210 = vector.shape_cast %209 : vector<1x8x128xf32> to vector<8x128xf32>
    %211 = vector.shape_cast %207 : vector<8x128xf32> to vector<1x8x128xf32>
    tpu.vector_store %arg4[%208, %c0_60, %c0_61], %211 {strides = array<i32>} : memref<8x8x128xf32, #tpu.memory_space<vmem>>, vector<1x8x128xf32>,
    %c6_i32 = arith.constant 6 : i32
    %212 = arith.index_cast %c6_i32 : i32 to index
    %c0_62 = arith.constant 0 : index
    %c0_63 = arith.constant 0 : index
    %213 = vector.load %arg0[%212, %c0_62, %c0_63] : memref<8x8x512xf32, #tpu.memory_space<vmem>>, vector<1x8x512xf32>
    %214 = vector.shape_cast %213 : vector<1x8x512xf32> to vector<8x512xf32>
    %c0_64 = arith.constant 0 : index
    %c0_65 = arith.constant 0 : index
    %215 = vector.load %arg3[%c0_64, %c0_65] : memref<128x512xf32, #tpu.memory_space<vmem>>, vector<128x512xf32>
    %cst_66 = arith.constant dense<0.000000e+00> : vector<8x512xf32>
    %216 = tpu.matmul %207, %215, %cst_66 {dimension_numbers = #tpu.dot_dimension_numbers<[1], [0], [0], [1], [0, 0, 1, 1], [], []>} : vector<8x128xf32>, vector<128x512xf32>, vector<8x512xf32> -> vector<8x512xf32>
    %217 = arith.addf %214, %216 : vector<8x512xf32>
    %218 = vector.extract_strided_slice %217 {offsets = [0, 0], sizes = [8, 128], strides = [1, 1]} : vector<8x512xf32> to vector<8x128xf32>
    %219 = arith.negf %218 : vector<8x128xf32>
    %220 = math.exp %219 : vector<8x128xf32>
    %cst_67 = arith.constant 1.000000e+00 : f32
    %221 = vector.broadcast %cst_67 : f32 to vector<8x128xf32>
    %222 = arith.addf %221, %220 : vector<8x128xf32>
    %223 = arith.divf %221, %222 : vector<8x128xf32>
    %224 = vector.extract_strided_slice %217 {offsets = [0, 128], sizes = [8, 128], strides = [1, 1]} : vector<8x512xf32> to vector<8x128xf32>
    %225 = arith.negf %224 : vector<8x128xf32>
    %226 = math.exp %225 : vector<8x128xf32>
    %cst_68 = arith.constant 1.000000e+00 : f32
    %227 = vector.broadcast %cst_68 : f32 to vector<8x128xf32>
    %228 = arith.addf %227, %226 : vector<8x128xf32>
    %229 = arith.divf %227, %228 : vector<8x128xf32>
    %230 = vector.extract_strided_slice %217 {offsets = [0, 256], sizes = [8, 128], strides = [1, 1]} : vector<8x512xf32> to vector<8x128xf32>
    %231 = math.tanh %230 : vector<8x128xf32>
    %232 = vector.extract_strided_slice %217 {offsets = [0, 384], sizes = [8, 128], strides = [1, 1]} : vector<8x512xf32> to vector<8x128xf32>
    %233 = arith.negf %232 : vector<8x128xf32>
    %234 = math.exp %233 : vector<8x128xf32>
    %cst_69 = arith.constant 1.000000e+00 : f32
    %235 = vector.broadcast %cst_69 : f32 to vector<8x128xf32>
    %236 = arith.addf %235, %234 : vector<8x128xf32>
    %237 = arith.divf %235, %236 : vector<8x128xf32>
    %238 = arith.mulf %229, %205 : vector<8x128xf32>
    %239 = arith.mulf %223, %231 : vector<8x128xf32>
    %240 = arith.addf %238, %239 : vector<8x128xf32>
    %241 = math.tanh %240 : vector<8x128xf32>
    %242 = arith.mulf %237, %241 : vector<8x128xf32>
    %243 = arith.index_cast %c6_i32 : i32 to index
    %c0_70 = arith.constant 0 : index
    %c0_71 = arith.constant 0 : index
    %244 = vector.load %arg4[%243, %c0_70, %c0_71] : memref<8x8x128xf32, #tpu.memory_space<vmem>>, vector<1x8x128xf32>
    %245 = vector.shape_cast %244 : vector<1x8x128xf32> to vector<8x128xf32>
    %246 = vector.shape_cast %242 : vector<8x128xf32> to vector<1x8x128xf32>
    tpu.vector_store %arg4[%243, %c0_70, %c0_71], %246 {strides = array<i32>} : memref<8x8x128xf32, #tpu.memory_space<vmem>>, vector<1x8x128xf32>,
    %c7_i32 = arith.constant 7 : i32
    %247 = arith.index_cast %c7_i32 : i32 to index
    %c0_72 = arith.constant 0 : index
    %c0_73 = arith.constant 0 : index
    %248 = vector.load %arg0[%247, %c0_72, %c0_73] : memref<8x8x512xf32, #tpu.memory_space<vmem>>, vector<1x8x512xf32>
    %249 = vector.shape_cast %248 : vector<1x8x512xf32> to vector<8x512xf32>
    %c0_74 = arith.constant 0 : index
    %c0_75 = arith.constant 0 : index
    %250 = vector.load %arg3[%c0_74, %c0_75] : memref<128x512xf32, #tpu.memory_space<vmem>>, vector<128x512xf32>
    %cst_76 = arith.constant dense<0.000000e+00> : vector<8x512xf32>
    %251 = tpu.matmul %242, %250, %cst_76 {dimension_numbers = #tpu.dot_dimension_numbers<[1], [0], [0], [1], [0, 0, 1, 1], [], []>} : vector<8x128xf32>, vector<128x512xf32>, vector<8x512xf32> -> vector<8x512xf32>
    %252 = arith.addf %249, %251 : vector<8x512xf32>
    %253 = vector.extract_strided_slice %252 {offsets = [0, 0], sizes = [8, 128], strides = [1, 1]} : vector<8x512xf32> to vector<8x128xf32>
    %254 = arith.negf %253 : vector<8x128xf32>
    %255 = math.exp %254 : vector<8x128xf32>
    %cst_77 = arith.constant 1.000000e+00 : f32
    %256 = vector.broadcast %cst_77 : f32 to vector<8x128xf32>
    %257 = arith.addf %256, %255 : vector<8x128xf32>
    %258 = arith.divf %256, %257 : vector<8x128xf32>
    %259 = vector.extract_strided_slice %252 {offsets = [0, 128], sizes = [8, 128], strides = [1, 1]} : vector<8x512xf32> to vector<8x128xf32>
    %260 = arith.negf %259 : vector<8x128xf32>
    %261 = math.exp %260 : vector<8x128xf32>
    %cst_78 = arith.constant 1.000000e+00 : f32
    %262 = vector.broadcast %cst_78 : f32 to vector<8x128xf32>
    %263 = arith.addf %262, %261 : vector<8x128xf32>
    %264 = arith.divf %262, %263 : vector<8x128xf32>
    %265 = vector.extract_strided_slice %252 {offsets = [0, 256], sizes = [8, 128], strides = [1, 1]} : vector<8x512xf32> to vector<8x128xf32>
    %266 = math.tanh %265 : vector<8x128xf32>
    %267 = vector.extract_strided_slice %252 {offsets = [0, 384], sizes = [8, 128], strides = [1, 1]} : vector<8x512xf32> to vector<8x128xf32>
    %268 = arith.negf %267 : vector<8x128xf32>
    %269 = math.exp %268 : vector<8x128xf32>
    %cst_79 = arith.constant 1.000000e+00 : f32
    %270 = vector.broadcast %cst_79 : f32 to vector<8x128xf32>
    %271 = arith.addf %270, %269 : vector<8x128xf32>
    %272 = arith.divf %270, %271 : vector<8x128xf32>
    %273 = arith.mulf %264, %240 : vector<8x128xf32>
    %274 = arith.mulf %258, %266 : vector<8x128xf32>
    %275 = arith.addf %273, %274 : vector<8x128xf32>
    %276 = math.tanh %275 : vector<8x128xf32>
    %277 = arith.mulf %272, %276 : vector<8x128xf32>
    %278 = arith.index_cast %c7_i32 : i32 to index
    %c0_80 = arith.constant 0 : index
    %c0_81 = arith.constant 0 : index
    %279 = vector.load %arg4[%278, %c0_80, %c0_81] : memref<8x8x128xf32, #tpu.memory_space<vmem>>, vector<1x8x128xf32>
    %280 = vector.shape_cast %279 : vector<1x8x128xf32> to vector<8x128xf32>
    %281 = vector.shape_cast %277 : vector<8x128xf32> to vector<1x8x128xf32>
    tpu.vector_store %arg4[%278, %c0_80, %c0_81], %281 {strides = array<i32>} : memref<8x8x128xf32, #tpu.memory_space<vmem>>, vector<1x8x128xf32>,
    %c8_i32 = arith.constant 8 : i32
    %c0_82 = arith.constant 0 : index
    %c0_83 = arith.constant 0 : index
    %282 = vector.load %arg5[%c0_82, %c0_83] : memref<8x128xf32, #tpu.memory_space<vmem>>, vector<8x128xf32>
    tpu.vector_store %arg5[%c0_82, %c0_83], %277 {strides = array<i32>} : memref<8x128xf32, #tpu.memory_space<vmem>>, vector<8x128xf32>,
    %c0_84 = arith.constant 0 : index
    %c0_85 = arith.constant 0 : index
    %283 = vector.load %arg6[%c0_84, %c0_85] : memref<8x128xf32, #tpu.memory_space<vmem>>, vector<8x128xf32>
    tpu.vector_store %arg6[%c0_84, %c0_85], %275 {strides = array<i32>} : memref<8x128xf32, #tpu.memory_space<vmem>>, vector<8x128xf32>,
    return
  }
}

module attributes {stable_mosaic.version = 11 : i64} {
  func.func @_matmul_bias_kernel(%arg0: i32, %arg1: memref<64x128xf32, #tpu.memory_space<vmem>>, %arg2: memref<128x128xf32, #tpu.memory_space<vmem>>, %arg3: memref<1x128xf32, #tpu.memory_space<vmem>>, %arg4: memref<64x128xf32, #tpu.memory_space<vmem>>) attributes {dimension_semantics = [#tpu.dimension_semantics<parallel>], iteration_bounds = array<i64: 1>, scalar_prefetch = 0 : i64, scratch_operands = 0 : i64, tpu.core_type = #tpu.core_type<tc>, window_params = [{transform_indices = @transform_0, window_bounds = array<i64: 64, 128>}, {pipeline_mode = #tpu.pipeline_mode<synchronous>, transform_indices = @transform_1, window_bounds = array<i64: 128, 128>}, {pipeline_mode = #tpu.pipeline_mode<synchronous>, transform_indices = @transform_2, window_bounds = array<i64: 1, 128>}, {transform_indices = @transform_3, window_bounds = array<i64: 64, 128>}]} {
    %c0 = arith.constant 0 : index
    %c0_0 = arith.constant 0 : index
    %0 = vector.load %arg1[%c0, %c0_0] : memref<64x128xf32, #tpu.memory_space<vmem>>, vector<64x128xf32>
    %c0_1 = arith.constant 0 : index
    %c0_2 = arith.constant 0 : index
    %1 = vector.load %arg2[%c0_1, %c0_2] : memref<128x128xf32, #tpu.memory_space<vmem>>, vector<128x128xf32>
    %cst = arith.constant dense<0.000000e+00> : vector<64x128xf32>
    %2 = tpu.matmul %0, %1, %cst {dimension_numbers = #tpu.dot_dimension_numbers<[1], [0], [0], [1], [0, 0, 1, 1], [], []>} : vector<64x128xf32>, vector<128x128xf32>, vector<64x128xf32> -> vector<64x128xf32>
    %c0_3 = arith.constant 0 : index
    %c0_4 = arith.constant 0 : index
    %3 = vector.load %arg3[%c0_3, %c0_4] : memref<1x128xf32, #tpu.memory_space<vmem>>, vector<1x128xf32>
    %4 = vector.broadcast %3 : vector<1x128xf32> to vector<64x128xf32>
    %5 = arith.addf %2, %4 : vector<64x128xf32>
    %c0_5 = arith.constant 0 : index
    %c0_6 = arith.constant 0 : index
    %6 = vector.load %arg4[%c0_5, %c0_6] : memref<64x128xf32, #tpu.memory_space<vmem>>, vector<64x128xf32>
    tpu.vector_store %arg4[%c0_5, %c0_6], %5 {strides = array<i32>} : memref<64x128xf32, #tpu.memory_space<vmem>>, vector<64x128xf32>,
    return
  }
  func.func @transform_0(%arg0: i32) -> (i32, i32) {
    %c0_i32 = arith.constant 0 : i32
    %c0_i32_0 = arith.constant 0 : i32
    return %arg0, %c0_i32 : i32, i32
  }
  func.func @transform_1(%arg0: i32) -> (i32, i32) {
    %c0_i32 = arith.constant 0 : i32
    %c0_i32_0 = arith.constant 0 : i32
    %c0_i32_1 = arith.constant 0 : i32
    return %c0_i32, %c0_i32_0 : i32, i32
  }
  func.func @transform_2(%arg0: i32) -> (i32, i32) {
    %c0_i32 = arith.constant 0 : i32
    %c0_i32_0 = arith.constant 0 : i32
    %c0_i32_1 = arith.constant 0 : i32
    return %c0_i32, %c0_i32_0 : i32, i32
  }
  func.func @transform_3(%arg0: i32) -> (i32, i32) {
    %c0_i32 = arith.constant 0 : i32
    %c0_i32_0 = arith.constant 0 : i32
    return %arg0, %c0_i32 : i32, i32
  }
}

</mosaic_0001>

<bundles_post_ra>
// kernel: lstm_model_forward.5
= control target key start
LH: loop header
LB: loop body
LE: loop exit
PB: predicated region body
PF: predicated region fallthrough
CT: control target
= control target key end

     0   :  { %v364_v3 = vmov 0.0   ;;  %vm52_vm0 = vcmask 130048   ;;  %v32_v21 = vlaneseq  ;;  %s588_s1 = inlined_call_operand.vmem [shape: f32[16,512], index: 1, kind: input, shape index: {}]   ;;  %s589_s0 = inlined_call_operand.vmem [shape: f32[64,16], index: 0, kind: input, shape index: {}]   ;;  %s590_s2 = inlined_call_operand.vmem [shape: f32[1,512], index: 2, kind: input, shape index: {}]   ;;  %s591_s3 = inlined_call_operand.vmem [shape: f32[64,512], index: 3, kind: output, shape index: {}]  }
   0x1   :  { %v23_v0 = vld [vmem:[%s588_s1 + $0x8] sm:$0xff]  ;;  %v25_v2 = vld [vmem:[%s588_s1 + $0x18] sm:$0xff]  ;;  %141 = vmatprep.mubr.f32.mxu0 %v364_v3  ;;  %254 = vmatprep.mubr.f32.mxu1 %v364_v3  ;;  %v22_v6 = vld [vmem:[%s588_s1] sm:$0xff] }
   0x2   :  { %v27_v1 = vld [vmem:[%s588_s1 + $0x28] sm:$0xff]  ;;  %v29_v5 = vld [vmem:[%s588_s1 + $0x38] sm:$0xff]  ;;  %v26_v7 = vld [vmem:[%s588_s1 + $0x20] sm:$0xff]  ;;  %v33_v22 = vshrl.u32 %v32_v21, 7 }
   0x3   :  { %v355_v4 = vpack.c.bf16 %v27_v1, %v23_v0  ;;  %v359_v8 = vpack.c.bf16 %v29_v5, %v25_v2  ;;  %v357_v9 = vpack.c.bf16 %v26_v7, %v22_v6  ;;  %v24_v10 = vld [vmem:[%s588_s1 + $0x10] sm:$0xff]  ;;  %v14_v13 = vld [vmem:[%s589_s0] sm:$0xff]  ;;  %v15_v14 = vld [vmem:[%s589_s0 + $0x8] sm:$0xff] }
   0x4   :  { %v28_v11 = vld [vmem:[%s588_s1 + $0x30] sm:$0xff]  ;;  %v17_v16 = vld [vmem:[%s589_s0 + $0x18] sm:$0xff]  ;;  %v18_v17 = vld [vmem:[%s589_s0 + $0x20] sm:$0xff]  ;;  %v34_v23 = vsub.s32 0, %v33_v22  ;;  %v42_v25 = vsub.s32 2, %v33_v22  ;;  %v38_v26 = vsub.s32 1, %v33_v22 }
   0x5   :  { %356 = vmatprep.subr.bf16.mxu0 %v355_v4  ;;  %v361_v12 = vpack.c.bf16 %v28_v11, %v24_v10  ;;  %360 = vmatprep.subr.bf16.mxu1 %v359_v8  ;;  %v16_v15 = vld [vmem:[%s589_s0 + $0x10] sm:$0xff]  ;;  %v19_v18 = vld [vmem:[%s589_s0 + $0x28] sm:$0xff]  ;;  %v21_v20 = vld [vmem:[%s589_s0 + $0x38] sm:$0xff]  ;;  %v46_v27 = vsub.s32 3, %v33_v22 }
   0x6   :  { %358 = vmatpush1.bf16.msra.mxu0 %v357_v9  ;;  %v20_v19 = vld [vmem:[%s589_s0 + $0x30] sm:$0xff]  ;;  %v30_v24 = vld [vmem:[%s590_s2] sm:$0xf] }
   0x7   :  { %362 = vmatpush1.bf16.msra.mxu1 %v361_v12  ;;  %v452_v28 = vrot.slane %v30_v24, %v34_v23  ;;  %v454_v29 = vrot.slane %v30_v24, %v42_v25  ;;  %v456_v30 = vrot.slane %v30_v24, %v38_v26  ;;  %v458_v31 = vrot.slane %v30_v24, %v46_v27 }
   0x9   :  { %339 = vmatmul.mubr.msk.f32.vlgmr.msra.gmra.mrb[0].mxu0 %vm52_vm0, %v14_v13 }
   0xa   :  { %347 = vmatmul.mubr.msk.f32.vlgmr.msra.gmra.mrb[0].mxu1 %vm52_vm0, %v14_v13  ;;  %147 = vmatprep.mubr.f32.mxu0 %v364_v3 }
   0xb   :  { %260 = vmatprep.mubr.f32.mxu1 %v364_v3 }
   0xd   :  { %340 = vmatmul.mubr.msk.f32.gmra.mrb[2].mxu0 %vm52_vm0, %v15_v14 }
   0xe   :  { %348 = vmatmul.mubr.msk.f32.gmra.mrb[2].mxu1 %vm52_vm0, %v15_v14  ;;  %153 = vmatprep.mubr.f32.mxu0 %v364_v3 }
   0xf   :  { %266 = vmatprep.mubr.f32.mxu1 %v364_v3 }
  0x11   :  { %341 = vmatmul.mubr.msk.f32.gmra.mrb[4].mxu0 %vm52_vm0, %v16_v15 }
  0x12   :  { %349 = vmatmul.mubr.msk.f32.gmra.mrb[4].mxu1 %vm52_vm0, %v16_v15  ;;  %159 = vmatprep.mubr.f32.mxu0 %v364_v3 }
  0x13   :  { %272 = vmatprep.mubr.f32.mxu1 %v364_v3 }
  0x15   :  { %342 = vmatmul.mubr.msk.f32.gmra.mrb[6].mxu0 %vm52_vm0, %v17_v16 }
  0x16   :  { %350 = vmatmul.mubr.msk.f32.gmra.mrb[6].mxu1 %vm52_vm0, %v17_v16  ;;  %165 = vmatprep.mubr.f32.mxu0 %v364_v3 }
  0x17   :  { %278 = vmatprep.mubr.f32.mxu1 %v364_v3 }
  0x19   :  { %343 = vmatmul.mubr.msk.f32.gmra.mrb[8].mxu0 %vm52_vm0, %v18_v17 }
  0x1a   :  { %351 = vmatmul.mubr.msk.f32.gmra.mrb[8].mxu1 %vm52_vm0, %v18_v17  ;;  %171 = vmatprep.mubr.f32.mxu0 %v364_v3 }
  0x1b   :  { %284 = vmatprep.mubr.f32.mxu1 %v364_v3 }
  0x1d   :  { %344 = vmatmul.mubr.msk.f32.gmra.mrb[10].mxu0 %vm52_vm0, %v19_v18 }
  0x1e   :  { %352 = vmatmul.mubr.msk.f32.gmra.mrb[10].mxu1 %vm52_vm0, %v19_v18  ;;  %177 = vmatprep.mubr.f32.mxu0 %v364_v3 }
  0x1f   :  { %290 = vmatprep.mubr.f32.mxu1 %v364_v3 }
  0x21   :  { %345 = vmatmul.mubr.msk.f32.gmra.mrb[12].mxu0 %vm52_vm0, %v20_v19 }
  0x22   :  { %353 = vmatmul.mubr.msk.f32.gmra.mrb[12].mxu1 %vm52_vm0, %v20_v19  ;;  %183 = vmatprep.mubr.f32.mxu0 %v364_v3 }
  0x23   :  { %296 = vmatprep.mubr.f32.mxu1 %v364_v3 }
  0x25   :  { %346 = vmatmul.mubr.msk.f32.gmra.mrb[14].mxu0 %vm52_vm0, %v21_v20 }
  0x26   :  { %354 = vmatmul.mubr.msk.f32.gmra.mrb[14].mxu1 %vm52_vm0, %v21_v20 }
  0xdc   :  { %v143_v32 = vpop.f32.mrb[0].mxu0 }
  0xdd   :  { %v144_v33 = vadd.f32 %v143_v32, %v452_v28  ;;  %v256_v34 = vpop.f32.mrb[0].mxu1  ;;  %v145_v35 = vpop.f32.mrb[1].mxu0 }
  0xde   :  { %v257_v36 = vadd.f32 %v256_v34, %v454_v29  ;;  %v146_v37 = vadd.f32 %v145_v35, %v456_v30  ;;  %v258_v38 = vpop.f32.mrb[1].mxu1 }
  0xdf   :  { %303 = vst [vmem:[%s591_s3] sm:$0xff] %v144_v33  ;;  %v259_v39 = vadd.f32 %v258_v38, %v458_v31 }
  0xe0   :  { %305 = vst [vmem:[%s591_s3 + $0x10] sm:$0xff] %v257_v36  ;;  %304 = vst [vmem:[%s591_s3 + $0x8] sm:$0xff] %v146_v37  ;;  %v149_v40 = vpop.f32.mrb[2].mxu0 }
  0xe1   :  { %306 = vst [vmem:[%s591_s3 + $0x18] sm:$0xff] %v259_v39  ;;  %v150_v41 = vadd.f32 %v149_v40, %v452_v28  ;;  %v262_v42 = vpop.f32.mrb[2].mxu1  ;;  %v151_v43 = vpop.f32.mrb[3].mxu0 }
  0xe2   :  { %v263_v44 = vadd.f32 %v262_v42, %v454_v29  ;;  %v152_v45 = vadd.f32 %v151_v43, %v456_v30  ;;  %v264_v46 = vpop.f32.mrb[3].mxu1 }
  0xe3   :  { %307 = vst [vmem:[%s591_s3 + $0x20] sm:$0xff] %v150_v41  ;;  %v265_v47 = vadd.f32 %v264_v46, %v458_v31 }
  0xe4   :  { %309 = vst [vmem:[%s591_s3 + $0x30] sm:$0xff] %v263_v44  ;;  %308 = vst [vmem:[%s591_s3 + $0x28] sm:$0xff] %v152_v45  ;;  %v155_v48 = vpop.f32.mrb[4].mxu0 }
  0xe5   :  { %310 = vst [vmem:[%s591_s3 + $0x38] sm:$0xff] %v265_v47  ;;  %v156_v49 = vadd.f32 %v155_v48, %v452_v28  ;;  %v268_v50 = vpop.f32.mrb[4].mxu1  ;;  %v157_v51 = vpop.f32.mrb[5].mxu0 }
  0xe6   :  { %v269_v52 = vadd.f32 %v268_v50, %v454_v29  ;;  %v158_v53 = vadd.f32 %v157_v51, %v456_v30  ;;  %v270_v54 = vpop.f32.mrb[5].mxu1 }
  0xe7   :  { %311 = vst [vmem:[%s591_s3 + $0x40] sm:$0xff] %v156_v49  ;;  %v271_v55 = vadd.f32 %v270_v54, %v458_v31 }
  0xe8   :  { %313 = vst [vmem:[%s591_s3 + $0x50] sm:$0xff] %v269_v52  ;;  %312 = vst [vmem:[%s591_s3 + $0x48] sm:$0xff] %v158_v53  ;;  %v161_v56 = vpop.f32.mrb[6].mxu0 }
  0xe9   :  { %314 = vst [vmem:[%s591_s3 + $0x58] sm:$0xff] %v271_v55  ;;  %v162_v57 = vadd.f32 %v161_v56, %v452_v28  ;;  %v274_v58 = vpop.f32.mrb[6].mxu1  ;;  %v163_v59 = vpop.f32.mrb[7].mxu0 }
  0xea   :  { %v275_v60 = vadd.f32 %v274_v58, %v454_v29  ;;  %v164_v61 = vadd.f32 %v163_v59, %v456_v30  ;;  %v276_v62 = vpop.f32.mrb[7].mxu1 }
  0xeb   :  { %315 = vst [vmem:[%s591_s3 + $0x60] sm:$0xff] %v162_v57  ;;  %v277_v63 = vadd.f32 %v276_v62, %v458_v31 }
  0xec   :  { %317 = vst [vmem:[%s591_s3 + $0x70] sm:$0xff] %v275_v60  ;;  %316 = vst [vmem:[%s591_s3 + $0x68] sm:$0xff] %v164_v61  ;;  %v167_v0 = vpop.f32.mrb[8].mxu0 }
  0xed   :  { %318 = vst [vmem:[%s591_s3 + $0x78] sm:$0xff] %v277_v63  ;;  %v168_v1 = vadd.f32 %v167_v0, %v452_v28  ;;  %v280_v2 = vpop.f32.mrb[8].mxu1  ;;  %v169_v3 = vpop.f32.mrb[9].mxu0 }
  0xee   :  { %v281_v4 = vadd.f32 %v280_v2, %v454_v29  ;;  %v170_v5 = vadd.f32 %v169_v3, %v456_v30  ;;  %v282_v6 = vpop.f32.mrb[9].mxu1 }
  0xef   :  { %319 = vst [vmem:[%s591_s3 + $0x80] sm:$0xff] %v168_v1  ;;  %v283_v7 = vadd.f32 %v282_v6, %v458_v31 }
  0xf0   :  { %321 = vst [vmem:[%s591_s3 + $0x90] sm:$0xff] %v281_v4  ;;  %320 = vst [vmem:[%s591_s3 + $0x88] sm:$0xff] %v170_v5  ;;  %v173_v8 = vpop.f32.mrb[10].mxu0 }
  0xf1   :  { %322 = vst [vmem:[%s591_s3 + $0x98] sm:$0xff] %v283_v7  ;;  %v174_v9 = vadd.f32 %v173_v8, %v452_v28  ;;  %v286_v10 = vpop.f32.mrb[10].mxu1  ;;  %v175_v11 = vpop.f32.mrb[11].mxu0 }
  0xf2   :  { %v287_v12 = vadd.f32 %v286_v10, %v454_v29  ;;  %v176_v13 = vadd.f32 %v175_v11, %v456_v30  ;;  %v288_v14 = vpop.f32.mrb[11].mxu1 }
  0xf3   :  { %323 = vst [vmem:[%s591_s3 + $0xa0] sm:$0xff] %v174_v9  ;;  %v289_v15 = vadd.f32 %v288_v14, %v458_v31 }
  0xf4   :  { %325 = vst [vmem:[%s591_s3 + $0xb0] sm:$0xff] %v287_v12  ;;  %324 = vst [vmem:[%s591_s3 + $0xa8] sm:$0xff] %v176_v13  ;;  %v179_v16 = vpop.f32.mrb[12].mxu0 }
  0xf5   :  { %326 = vst [vmem:[%s591_s3 + $0xb8] sm:$0xff] %v289_v15  ;;  %v180_v17 = vadd.f32 %v179_v16, %v452_v28  ;;  %v292_v18 = vpop.f32.mrb[12].mxu1  ;;  %v181_v19 = vpop.f32.mrb[13].mxu0 }
  0xf6   :  { %v293_v20 = vadd.f32 %v292_v18, %v454_v29  ;;  %v182_v21 = vadd.f32 %v181_v19, %v456_v30  ;;  %v294_v22 = vpop.f32.mrb[13].mxu1 }
  0xf7   :  { %327 = vst [vmem:[%s591_s3 + $0xc0] sm:$0xff] %v180_v17  ;;  %v295_v23 = vadd.f32 %v294_v22, %v458_v31 }
  0xf8   :  { %329 = vst [vmem:[%s591_s3 + $0xd0] sm:$0xff] %v293_v20  ;;  %328 = vst [vmem:[%s591_s3 + $0xc8] sm:$0xff] %v182_v21  ;;  %v185_v24 = vpop.f32.mrb[14].mxu0 }
  0xf9   :  { %330 = vst [vmem:[%s591_s3 + $0xd8] sm:$0xff] %v295_v23  ;;  %v186_v25 = vadd.f32 %v185_v24, %v452_v28  ;;  %v298_v26 = vpop.f32.mrb[14].mxu1  ;;  %v187_v27 = vpop.f32.mrb[15].mxu0 }
  0xfa   :  { %v299_v32 = vadd.f32 %v298_v26, %v454_v29  ;;  %v188_v33 = vadd.f32 %v187_v27, %v456_v30  ;;  %v300_v34 = vpop.f32.mrb[15].mxu1 }
  0xfb   :  { %331 = vst [vmem:[%s591_s3 + $0xe0] sm:$0xff] %v186_v25  ;;  %v301_v35 = vadd.f32 %v300_v34, %v458_v31 }
  0xfc   :  { %333 = vst [vmem:[%s591_s3 + $0xf0] sm:$0xff] %v299_v32  ;;  %332 = vst [vmem:[%s591_s3 + $0xe8] sm:$0xff] %v188_v33 }
  0xfd   :  { %334 = vst [vmem:[%s591_s3 + $0xf8] sm:$0xff] %v301_v35 }

// kernel: lstm_model_forward.9
= control target key start
LH: loop header
LB: loop body
LE: loop exit
PB: predicated region body
PF: predicated region fallthrough
CT: control target
= control target key end

     0   :  { %s398_s1 = inlined_call_operand.vmem [shape: f32[128,128], index: 1, kind: input, shape index: {}]   ;;  %s399_s0 = inlined_call_operand.vmem [shape: f32[64,128], index: 0, kind: input, shape index: {}]   ;;  %s400_s2 = inlined_call_operand.vmem [shape: f32[1,128], index: 2, kind: input, shape index: {}]   ;;  %s401_s3 = inlined_call_operand.vmem [shape: f32[64,128], index: 3, kind: output, shape index: {}]  }
   0x1   :  { %v22_v0 = vld [vmem:[%s398_s1] sm:$0xff]  ;;  %v23_v1 = vld [vmem:[%s398_s1 + $0x8] sm:$0xff]  ;;  %v24_v2 = vld [vmem:[%s398_s1 + $0x10] sm:$0xff] }
   0x2   :  { %v231_v3 = vpack.c.bf16 %v23_v1, %v22_v0  ;;  %v25_v4 = vld [vmem:[%s398_s1 + $0x18] sm:$0xff]  ;;  %v26_v6 = vld [vmem:[%s398_s1 + $0x20] sm:$0xff]  ;;  %v27_v7 = vld [vmem:[%s398_s1 + $0x28] sm:$0xff] }
   0x3   :  { %v235_v5 = vpack.c.bf16 %v25_v4, %v24_v2  ;;  %v239_v8 = vpack.c.bf16 %v27_v7, %v26_v6  ;;  %v14_v9 = vld [vmem:[%s399_s0] sm:$0xff]  ;;  %v28_v11 = vld [vmem:[%s398_s1 + $0x30] sm:$0xff]  ;;  %v29_v12 = vld [vmem:[%s398_s1 + $0x38] sm:$0xff] }
   0x4   :  { %232 = vmatprep.subr.bf16.mxu0 %v231_v3  ;;  %263 = vmatprep.subr.bf16.mxu1 %v231_v3  ;;  %v18_v10 = vld [vmem:[%s399_s0 + $0x20] sm:$0xff]  ;;  %v243_v13 = vpack.c.bf16 %v29_v12, %v28_v11  ;;  %v31_v15 = vld [vmem:[%s398_s1 + $0x48] sm:$0xff]  ;;  %v32_v17 = vld [vmem:[%s398_s1 + $0x50] sm:$0xff] }
   0x5   :  { %234 = vmatpush3.bf16.msra.mxu0 %v231_v3  ;;  %271 = vmatpush3.bf16.msra.mxu1 %v231_v3  ;;  %v30_v14 = vld [vmem:[%s398_s1 + $0x40] sm:$0xff]  ;;  %v33_v18 = vld [vmem:[%s398_s1 + $0x58] sm:$0xff]  ;;  %v35_v21 = vld [vmem:[%s398_s1 + $0x68] sm:$0xff] }
   0x6   :  { %236 = vmatprep.subr.bf16.mxu0 %v235_v5  ;;  %264 = vmatprep.subr.bf16.mxu1 %v235_v5  ;;  %v247_v16 = vpack.c.bf16 %v31_v15, %v30_v14  ;;  %v251_v19 = vpack.c.bf16 %v33_v18, %v32_v17  ;;  %v34_v20 = vld [vmem:[%s398_s1 + $0x60] sm:$0xff]  ;;  %v36_v23 = vld [vmem:[%s398_s1 + $0x70] sm:$0xff]  ;;  %v37_v24 = vld [vmem:[%s398_s1 + $0x78] sm:$0xff] }
   0x7   :  { %219 = vmatprep.mubr.f32.mxu0 %v14_v9  ;;  %225 = vmatprep.mubr.f32.mxu1 %v18_v10  ;;  %v255_v22 = vpack.c.bf16 %v35_v21, %v34_v20  ;;  %v259_v25 = vpack.c.bf16 %v37_v24, %v36_v23  ;;  %v15_v26 = vld [vmem:[%s399_s0 + $0x8] sm:$0xff]  ;;  %v16_v28 = vld [vmem:[%s399_s0 + $0x10] sm:$0xff]  ;;  %v17_v30 = vld [vmem:[%s399_s0 + $0x18] sm:$0xff] }
   0x8   :  { %v19_v27 = vld [vmem:[%s399_s0 + $0x28] sm:$0xff]  ;;  %v20_v29 = vld [vmem:[%s399_s0 + $0x30] sm:$0xff]  ;;  %v21_v31 = vld [vmem:[%s399_s0 + $0x38] sm:$0xff] }
   0x9   :  { %238 = vmatpush3.bf16.msra.mxu0 %v235_v5  ;;  %272 = vmatpush3.bf16.msra.mxu1 %v235_v5  ;;  %v162_v32 = vld [vmem:[%s400_s2] ss:$0 sm:$0xff] }
   0xa   :  { %240 = vmatprep.subr.bf16.mxu0 %v239_v8  ;;  %265 = vmatprep.subr.bf16.mxu1 %v239_v8 }
   0xd   :  { %242 = vmatpush3.bf16.msra.mxu0 %v239_v8  ;;  %273 = vmatpush3.bf16.msra.mxu1 %v239_v8 }
   0xe   :  { %244 = vmatprep.subr.bf16.mxu0 %v243_v13  ;;  %266 = vmatprep.subr.bf16.mxu1 %v243_v13 }
  0x11   :  { %246 = vmatpush3.bf16.msra.mxu0 %v243_v13  ;;  %274 = vmatpush3.bf16.msra.mxu1 %v243_v13 }
  0x12   :  { %248 = vmatprep.subr.bf16.mxu0 %v247_v16  ;;  %267 = vmatprep.subr.bf16.mxu1 %v247_v16 }
  0x15   :  { %250 = vmatpush3.bf16.msra.mxu0 %v247_v16  ;;  %275 = vmatpush3.bf16.msra.mxu1 %v247_v16 }
  0x16   :  { %252 = vmatprep.subr.bf16.mxu0 %v251_v19  ;;  %268 = vmatprep.subr.bf16.mxu1 %v251_v19 }
  0x19   :  { %254 = vmatpush3.bf16.msra.mxu0 %v251_v19  ;;  %276 = vmatpush3.bf16.msra.mxu1 %v251_v19 }
  0x1a   :  { %256 = vmatprep.subr.bf16.mxu0 %v255_v22  ;;  %269 = vmatprep.subr.bf16.mxu1 %v255_v22 }
  0x1d   :  { %258 = vmatpush3.bf16.msra.mxu0 %v255_v22  ;;  %277 = vmatpush3.bf16.msra.mxu1 %v255_v22 }
  0x1e   :  { %260 = vmatprep.subr.bf16.mxu0 %v259_v25  ;;  %270 = vmatprep.subr.bf16.mxu1 %v259_v25 }
  0x21   :  { %262 = vmatpush3.bf16.msra.mxu0 %v259_v25  ;;  %278 = vmatpush3.bf16.msra.mxu1 %v259_v25 }
  0x24   :  { %220 = vmatmul.mubr.f32.vlgmr.msra.gmra.mrb[0].mxu0 %v15_v26  ;;  %226 = vmatmul.mubr.f32.vlgmr.msra.gmra.mrb[0].mxu1 %v19_v27 }
  0x25   :  { %222 = vmatprep.mubr.f32.mxu0 %v16_v28  ;;  %228 = vmatprep.mubr.f32.mxu1 %v20_v29 }
  0x28   :  { %223 = vmatmul.mubr.f32.gmra.mrb[2].mxu0 %v17_v30  ;;  %229 = vmatmul.mubr.f32.gmra.mrb[2].mxu1 %v21_v31 }
  0xf7   :  { %v221_v33 = vpop.f32.mrb[0].mxu0  ;;  %v227_v34 = vpop.f32.mrb[0].mxu1 }
  0xf8   :  { %v117_v35 = vadd.f32 %v221_v33, %v162_v32  ;;  %v137_v36 = vadd.f32 %v227_v34, %v162_v32  ;;  %v111_v37 = vpop.f32.mrb[1].mxu0  ;;  %v131_v38 = vpop.f32.mrb[1].mxu1 }
  0xf9   :  { %v112_v39 = vadd.f32 %v162_v32, %v111_v37  ;;  %v132_v40 = vadd.f32 %v162_v32, %v131_v38 }
  0xfa   :  { %151 = vst [vmem:[%s401_s3 + $0x8] sm:$0xff] %v117_v35  ;;  %155 = vst [vmem:[%s401_s3 + $0x28] sm:$0xff] %v137_v36 }
  0xfb   :  { %150 = vst [vmem:[%s401_s3] sm:$0xff] %v112_v39  ;;  %154 = vst [vmem:[%s401_s3 + $0x20] sm:$0xff] %v132_v40  ;;  %v224_v41 = vpop.f32.mrb[2].mxu0  ;;  %v230_v42 = vpop.f32.mrb[2].mxu1 }
  0xfc   :  { %v127_v43 = vadd.f32 %v224_v41, %v162_v32  ;;  %v147_v44 = vadd.f32 %v230_v42, %v162_v32  ;;  %v121_v45 = vpop.f32.mrb[3].mxu0  ;;  %v141_v46 = vpop.f32.mrb[3].mxu1 }
  0xfd   :  { %v122_v47 = vadd.f32 %v162_v32, %v121_v45  ;;  %v142_v48 = vadd.f32 %v162_v32, %v141_v46 }
  0xfe   :  { %153 = vst [vmem:[%s401_s3 + $0x18] sm:$0xff] %v127_v43  ;;  %157 = vst [vmem:[%s401_s3 + $0x38] sm:$0xff] %v147_v44 }
  0xff   :  { %152 = vst [vmem:[%s401_s3 + $0x10] sm:$0xff] %v122_v47  ;;  %156 = vst [vmem:[%s401_s3 + $0x30] sm:$0xff] %v142_v48 }

// kernel: lstm_model_forward.7
= control target key start
LH: loop header
LB: loop body
LE: loop exit
PB: predicated region body
PF: predicated region fallthrough
CT: control target
= control target key end

     0   :  { %v435_v3 = vmov 0.0   ;;  %s827_s1 = inlined_call_operand.vmem [shape: f32[128,512], index: 1, kind: input, shape index: {}]   ;;  %s828_s0 = inlined_call_operand.vmem [shape: f32[64,128], index: 0, kind: input, shape index: {}]   ;;  %s829_s2 = inlined_call_operand.vmem [shape: f32[1,512], index: 2, kind: input, shape index: {}]   ;;  %s830_s3 = inlined_call_operand.vmem [shape: f32[64,512], index: 3, kind: output, shape index: {}]  }
   0x1   :  { %v23_v0 = vld [vmem:[%s827_s1 + $0x8] sm:$0xff]  ;;  %v25_v2 = vld [vmem:[%s827_s1 + $0x18] sm:$0xff]  ;;  %172 = vmatprep.mubr.f32.mxu0 %v435_v3  ;;  %285 = vmatprep.mubr.f32.mxu1 %v435_v3  ;;  %v22_v6 = vld [vmem:[%s827_s1] sm:$0xff] }
   0x2   :  { %v27_v1 = vld [vmem:[%s827_s1 + $0x28] sm:$0xff]  ;;  %v29_v5 = vld [vmem:[%s827_s1 + $0x38] sm:$0xff]  ;;  %v26_v7 = vld [vmem:[%s827_s1 + $0x20] sm:$0xff] }
   0x3   :  { %v370_v4 = vpack.c.bf16 %v27_v1, %v23_v0  ;;  %v402_v8 = vpack.c.bf16 %v29_v5, %v25_v2  ;;  %v372_v9 = vpack.c.bf16 %v26_v7, %v22_v6  ;;  %v24_v10 = vld [vmem:[%s827_s1 + $0x10] sm:$0xff]  ;;  %v31_v12 = vld [vmem:[%s827_s1 + $0x48] sm:$0xff]  ;;  %v33_v15 = vld [vmem:[%s827_s1 + $0x58] sm:$0xff] }
   0x4   :  { %v28_v11 = vld [vmem:[%s827_s1 + $0x30] sm:$0xff]  ;;  %v35_v14 = vld [vmem:[%s827_s1 + $0x68] sm:$0xff]  ;;  %v37_v16 = vld [vmem:[%s827_s1 + $0x78] sm:$0xff] }
   0x5   :  { %371 = vmatprep.subr.bf16.mxu0 %v370_v4  ;;  %v404_v13 = vpack.c.bf16 %v28_v11, %v24_v10  ;;  %403 = vmatprep.subr.bf16.mxu1 %v402_v8  ;;  %v374_v17 = vpack.c.bf16 %v35_v14, %v31_v12  ;;  %v406_v18 = vpack.c.bf16 %v37_v16, %v33_v15  ;;  %v30_v19 = vld [vmem:[%s827_s1 + $0x40] sm:$0xff]  ;;  %v32_v21 = vld [vmem:[%s827_s1 + $0x50] sm:$0xff]  ;;  %v39_v24 = vld [vmem:[%s827_s1 + $0x88] sm:$0xff] }
   0x6   :  { %373 = vmatpush1.bf16.msra.mxu0 %v372_v9  ;;  %v34_v20 = vld [vmem:[%s827_s1 + $0x60] sm:$0xff]  ;;  %v36_v23 = vld [vmem:[%s827_s1 + $0x70] sm:$0xff]  ;;  %v43_v25 = vld [vmem:[%s827_s1 + $0xa8] sm:$0xff] }
   0x7   :  { %405 = vmatpush1.bf16.msra.mxu1 %v404_v13  ;;  %v376_v22 = vpack.c.bf16 %v34_v20, %v30_v19  ;;  %375 = vmatprep.subr.bf16.mxu0 %v374_v17  ;;  %v408_v26 = vpack.c.bf16 %v36_v23, %v32_v21  ;;  %v378_v27 = vpack.c.bf16 %v43_v25, %v39_v24  ;;  %v41_v28 = vld [vmem:[%s827_s1 + $0x98] sm:$0xff]  ;;  %v38_v30 = vld [vmem:[%s827_s1 + $0x80] sm:$0xff]  ;;  %v40_v33 = vld [vmem:[%s827_s1 + $0x90] sm:$0xff] }
   0x8   :  { %407 = vmatprep.subr.bf16.mxu1 %v406_v18  ;;  %v45_v29 = vld [vmem:[%s827_s1 + $0xb8] sm:$0xff]  ;;  %v42_v32 = vld [vmem:[%s827_s1 + $0xa0] sm:$0xff]  ;;  %v44_v34 = vld [vmem:[%s827_s1 + $0xb0] sm:$0xff] }
   0x9   :  { %v410_v31 = vpack.c.bf16 %v45_v29, %v41_v28  ;;  %v380_v35 = vpack.c.bf16 %v42_v32, %v38_v30  ;;  %v47_v36 = vld [vmem:[%s827_s1 + $0xc8] sm:$0xff]  ;;  %v49_v38 = vld [vmem:[%s827_s1 + $0xd8] sm:$0xff]  ;;  %v412_v39 = vpack.c.bf16 %v44_v34, %v40_v33  ;;  %v46_v42 = vld [vmem:[%s827_s1 + $0xc0] sm:$0xff] }
   0xa   :  { %377 = vmatpush1.bf16.msra.mxu0 %v376_v22  ;;  %v51_v37 = vld [vmem:[%s827_s1 + $0xe8] sm:$0xff]  ;;  %v53_v41 = vld [vmem:[%s827_s1 + $0xf8] sm:$0xff]  ;;  %v50_v43 = vld [vmem:[%s827_s1 + $0xe0] sm:$0xff] }
   0xb   :  { %409 = vmatpush1.bf16.msra.mxu1 %v408_v26  ;;  %379 = vmatprep.subr.bf16.mxu0 %v378_v27  ;;  %v382_v40 = vpack.c.bf16 %v51_v37, %v47_v36  ;;  %v414_v44 = vpack.c.bf16 %v53_v41, %v49_v38  ;;  %v48_v45 = vld [vmem:[%s827_s1 + $0xd0] sm:$0xff]  ;;  %v55_v47 = vld [vmem:[%s827_s1 + $0x108] sm:$0xff]  ;;  %v57_v49 = vld [vmem:[%s827_s1 + $0x118] sm:$0xff]  ;;  %v384_v51 = vpack.c.bf16 %v50_v43, %v46_v42  ;;  %v88_v42 = vlaneseq }
   0xc   :  { %411 = vmatprep.subr.bf16.mxu1 %v410_v31  ;;  %v52_v46 = vld [vmem:[%s827_s1 + $0xf0] sm:$0xff]  ;;  %v59_v48 = vld [vmem:[%s827_s1 + $0x128] sm:$0xff]  ;;  %v61_v50 = vld [vmem:[%s827_s1 + $0x138] sm:$0xff] }
   0xd   :  { %v416_v52 = vpack.c.bf16 %v52_v46, %v48_v45  ;;  %v386_v53 = vpack.c.bf16 %v59_v48, %v55_v47  ;;  %v54_v54 = vld [vmem:[%s827_s1 + $0x100] sm:$0xff]  ;;  %v56_v56 = vld [vmem:[%s827_s1 + $0x110] sm:$0xff]  ;;  %v418_v57 = vpack.c.bf16 %v61_v50, %v57_v49  ;;  %v63_v59 = vld [vmem:[%s827_s1 + $0x148] sm:$0xff]  ;;  %v89_v43 = vshrl.u32 %v88_v42, 7 }
   0xe   :  { %381 = vmatpush1.bf16.msra.mxu0 %v380_v35  ;;  %v58_v55 = vld [vmem:[%s827_s1 + $0x120] sm:$0xff]  ;;  %v60_v58 = vld [vmem:[%s827_s1 + $0x130] sm:$0xff]  ;;  %v67_v60 = vld [vmem:[%s827_s1 + $0x168] sm:$0xff] }
   0xf   :  { %413 = vmatpush1.bf16.msra.mxu1 %v412_v39  ;;  %383 = vmatprep.subr.bf16.mxu0 %v382_v40  ;;  %v65_v61 = vld [vmem:[%s827_s1 + $0x158] sm:$0xff]  ;;  %v388_v63 = vpack.c.bf16 %v58_v55, %v54_v54  ;;  %v420_v0 = vpack.c.bf16 %v60_v58, %v56_v56  ;;  %v390_v1 = vpack.c.bf16 %v67_v60, %v63_v59  ;;  %v62_v2 = vld [vmem:[%s827_s1 + $0x140] sm:$0xff]  ;;  %v64_v5 = vld [vmem:[%s827_s1 + $0x150] sm:$0xff]  ;;  %v98_v46 = vsub.s32 2, %v89_v43 }
  0x10   :  { %415 = vmatprep.subr.bf16.mxu1 %v414_v44  ;;  %v69_v62 = vld [vmem:[%s827_s1 + $0x178] sm:$0xff]  ;;  %v66_v4 = vld [vmem:[%s827_s1 + $0x160] sm:$0xff]  ;;  %v68_v7 = vld [vmem:[%s827_s1 + $0x170] sm:$0xff]  ;;  %v90_v44 = vsub.s32 0, %v89_v43  ;;  %v94_v47 = vsub.s32 1, %v89_v43  ;;  %v102_v48 = vsub.s32 3, %v89_v43 }
  0x11   :  { %v422_v6 = vpack.c.bf16 %v69_v62, %v65_v61  ;;  %v71_v8 = vld [vmem:[%s827_s1 + $0x188] sm:$0xff]  ;;  %v73_v10 = vld [vmem:[%s827_s1 + $0x198] sm:$0xff]  ;;  %v392_v12 = vpack.c.bf16 %v66_v4, %v62_v2  ;;  %v424_v13 = vpack.c.bf16 %v68_v7, %v64_v5  ;;  %v70_v15 = vld [vmem:[%s827_s1 + $0x180] sm:$0xff] }
  0x12   :  { %385 = vmatpush1.bf16.msra.mxu0 %v384_v51  ;;  %v75_v9 = vld [vmem:[%s827_s1 + $0x1a8] sm:$0xff]  ;;  %v77_v11 = vld [vmem:[%s827_s1 + $0x1b8] sm:$0xff]  ;;  %v74_v16 = vld [vmem:[%s827_s1 + $0x1a0] sm:$0xff] }
  0x13   :  { %417 = vmatpush1.bf16.msra.mxu1 %v416_v52  ;;  %387 = vmatprep.subr.bf16.mxu0 %v386_v53  ;;  %v394_v14 = vpack.c.bf16 %v75_v9, %v71_v8  ;;  %v72_v17 = vld [vmem:[%s827_s1 + $0x190] sm:$0xff]  ;;  %v426_v18 = vpack.c.bf16 %v77_v11, %v73_v10  ;;  %v79_v20 = vld [vmem:[%s827_s1 + $0x1c8] sm:$0xff]  ;;  %v81_v22 = vld [vmem:[%s827_s1 + $0x1d8] sm:$0xff]  ;;  %v396_v24 = vpack.c.bf16 %v74_v16, %v70_v15 }
  0x14   :  { %419 = vmatprep.subr.bf16.mxu1 %v418_v57  ;;  %v76_v19 = vld [vmem:[%s827_s1 + $0x1b0] sm:$0xff]  ;;  %v83_v21 = vld [vmem:[%s827_s1 + $0x1e8] sm:$0xff]  ;;  %v85_v23 = vld [vmem:[%s827_s1 + $0x1f8] sm:$0xff] }
  0x15   :  { %v428_v25 = vpack.c.bf16 %v76_v19, %v72_v17  ;;  %v398_v26 = vpack.c.bf16 %v83_v21, %v79_v20  ;;  %v78_v27 = vld [vmem:[%s827_s1 + $0x1c0] sm:$0xff]  ;;  %v430_v29 = vpack.c.bf16 %v85_v23, %v81_v22  ;;  %v80_v30 = vld [vmem:[%s827_s1 + $0x1d0] sm:$0xff]  ;;  %v15_v35 = vld [vmem:[%s828_s0 + $0x8] sm:$0xff] }
  0x16   :  { %389 = vmatpush1.bf16.msra.mxu0 %v388_v63  ;;  %v82_v28 = vld [vmem:[%s827_s1 + $0x1e0] sm:$0xff]  ;;  %v84_v31 = vld [vmem:[%s827_s1 + $0x1f0] sm:$0xff]  ;;  %v17_v37 = vld [vmem:[%s828_s0 + $0x18] sm:$0xff] }
  0x17   :  { %421 = vmatpush1.bf16.msra.mxu1 %v420_v0  ;;  %391 = vmatprep.subr.bf16.mxu0 %v390_v1  ;;  %v400_v32 = vpack.c.bf16 %v82_v28, %v78_v27  ;;  %v432_v33 = vpack.c.bf16 %v84_v31, %v80_v30  ;;  %v14_v34 = vld [vmem:[%s828_s0] sm:$0xff]  ;;  %v16_v36 = vld [vmem:[%s828_s0 + $0x10] sm:$0xff]  ;;  %v19_v39 = vld [vmem:[%s828_s0 + $0x28] sm:$0xff] }
  0x18   :  { %423 = vmatprep.subr.bf16.mxu1 %v422_v6  ;;  %v18_v38 = vld [vmem:[%s828_s0 + $0x20] sm:$0xff]  ;;  %v20_v40 = vld [vmem:[%s828_s0 + $0x30] sm:$0xff]  ;;  %v21_v41 = vld [vmem:[%s828_s0 + $0x38] sm:$0xff] }
  0x19   :  { %v86_v45 = vld [vmem:[%s829_s2] sm:$0xf] }
  0x1a   :  { %393 = vmatpush1.bf16.msra.mxu0 %v392_v12  ;;  %v691_v49 = vrot.slane %v86_v45, %v90_v44  ;;  %v693_v50 = vrot.slane %v86_v45, %v98_v46  ;;  %v695_v51 = vrot.slane %v86_v45, %v94_v47  ;;  %v697_v52 = vrot.slane %v86_v45, %v102_v48 }
  0x1b   :  { %425 = vmatpush1.bf16.msra.mxu1 %v424_v13  ;;  %395 = vmatprep.subr.bf16.mxu0 %v394_v14 }
  0x1c   :  { %427 = vmatprep.subr.bf16.mxu1 %v426_v18 }
  0x1e   :  { %397 = vmatpush1.bf16.msra.mxu0 %v396_v24 }
  0x1f   :  { %429 = vmatpush1.bf16.msra.mxu1 %v428_v25  ;;  %399 = vmatprep.subr.bf16.mxu0 %v398_v26 }
  0x20   :  { %431 = vmatprep.subr.bf16.mxu1 %v430_v29 }
  0x22   :  { %401 = vmatpush1.bf16.msra.mxu0 %v400_v32 }
  0x23   :  { %433 = vmatpush1.bf16.msra.mxu1 %v432_v33 }
  0x25   :  { %173 = vmatmul.mubr.f32.vlgmr.msra.gmra.mrb[0].mxu0 %v14_v34 }
  0x26   :  { %286 = vmatmul.mubr.f32.vlgmr.msra.gmra.mrb[0].mxu1 %v14_v34  ;;  %178 = vmatprep.mubr.f32.mxu0 %v435_v3 }
  0x27   :  { %291 = vmatprep.mubr.f32.mxu1 %v435_v3 }
  0x29   :  { %179 = vmatmul.mubr.f32.gmra.mrb[2].mxu0 %v15_v35 }
  0x2a   :  { %292 = vmatmul.mubr.f32.gmra.mrb[2].mxu1 %v15_v35  ;;  %184 = vmatprep.mubr.f32.mxu0 %v435_v3 }
  0x2b   :  { %297 = vmatprep.mubr.f32.mxu1 %v435_v3 }
  0x2d   :  { %185 = vmatmul.mubr.f32.gmra.mrb[4].mxu0 %v16_v36 }
  0x2e   :  { %298 = vmatmul.mubr.f32.gmra.mrb[4].mxu1 %v16_v36  ;;  %190 = vmatprep.mubr.f32.mxu0 %v435_v3 }
  0x2f   :  { %303 = vmatprep.mubr.f32.mxu1 %v435_v3 }
  0x31   :  { %191 = vmatmul.mubr.f32.gmra.mrb[6].mxu0 %v17_v37 }
  0x32   :  { %304 = vmatmul.mubr.f32.gmra.mrb[6].mxu1 %v17_v37  ;;  %196 = vmatprep.mubr.f32.mxu0 %v435_v3 }
  0x33   :  { %309 = vmatprep.mubr.f32.mxu1 %v435_v3 }
  0x35   :  { %197 = vmatmul.mubr.f32.gmra.mrb[8].mxu0 %v18_v38 }
  0x36   :  { %310 = vmatmul.mubr.f32.gmra.mrb[8].mxu1 %v18_v38  ;;  %202 = vmatprep.mubr.f32.mxu0 %v435_v3 }
  0x37   :  { %315 = vmatprep.mubr.f32.mxu1 %v435_v3 }
  0x39   :  { %203 = vmatmul.mubr.f32.gmra.mrb[10].mxu0 %v19_v39 }
  0x3a   :  { %316 = vmatmul.mubr.f32.gmra.mrb[10].mxu1 %v19_v39  ;;  %208 = vmatprep.mubr.f32.mxu0 %v435_v3 }
  0x3b   :  { %321 = vmatprep.mubr.f32.mxu1 %v435_v3 }
  0x3d   :  { %209 = vmatmul.mubr.f32.gmra.mrb[12].mxu0 %v20_v40 }
  0x3e   :  { %322 = vmatmul.mubr.f32.gmra.mrb[12].mxu1 %v20_v40  ;;  %214 = vmatprep.mubr.f32.mxu0 %v435_v3 }
  0x3f   :  { %327 = vmatprep.mubr.f32.mxu1 %v435_v3 }
  0x41   :  { %215 = vmatmul.mubr.f32.gmra.mrb[14].mxu0 %v21_v41 }
  0x42   :  { %328 = vmatmul.mubr.f32.gmra.mrb[14].mxu1 %v21_v41 }
  0xf8   :  { %v174_v3 = vpop.f32.mrb[0].mxu0 }
  0xf9   :  { %v175_v53 = vadd.f32 %v174_v3, %v691_v49  ;;  %v287_v54 = vpop.f32.mrb[0].mxu1  ;;  %v176_v55 = vpop.f32.mrb[1].mxu0 }
  0xfa   :  { %v288_v56 = vadd.f32 %v287_v54, %v693_v50  ;;  %v177_v57 = vadd.f32 %v176_v55, %v695_v51  ;;  %v289_v58 = vpop.f32.mrb[1].mxu1 }
  0xfb   :  { %334 = vst [vmem:[%s830_s3] sm:$0xff] %v175_v53  ;;  %v290_v59 = vadd.f32 %v289_v58, %v697_v52 }
  0xfc   :  { %336 = vst [vmem:[%s830_s3 + $0x10] sm:$0xff] %v288_v56  ;;  %335 = vst [vmem:[%s830_s3 + $0x8] sm:$0xff] %v177_v57  ;;  %v180_v60 = vpop.f32.mrb[2].mxu0 }
  0xfd   :  { %337 = vst [vmem:[%s830_s3 + $0x18] sm:$0xff] %v290_v59  ;;  %v181_v61 = vadd.f32 %v180_v60, %v691_v49  ;;  %v293_v62 = vpop.f32.mrb[2].mxu1  ;;  %v182_v63 = vpop.f32.mrb[3].mxu0 }
  0xfe   :  { %v294_v0 = vadd.f32 %v293_v62, %v693_v50  ;;  %v183_v1 = vadd.f32 %v182_v63, %v695_v51  ;;  %v295_v2 = vpop.f32.mrb[3].mxu1 }
  0xff   :  { %338 = vst [vmem:[%s830_s3 + $0x20] sm:$0xff] %v181_v61  ;;  %v296_v4 = vadd.f32 %v295_v2, %v697_v52 }
 0x100   :  { %340 = vst [vmem:[%s830_s3 + $0x30] sm:$0xff] %v294_v0  ;;  %339 = vst [vmem:[%s830_s3 + $0x28] sm:$0xff] %v183_v1  ;;  %v186_v5 = vpop.f32.mrb[4].mxu0 }
 0x101   :  { %341 = vst [vmem:[%s830_s3 + $0x38] sm:$0xff] %v296_v4  ;;  %v187_v6 = vadd.f32 %v186_v5, %v691_v49  ;;  %v299_v7 = vpop.f32.mrb[4].mxu1  ;;  %v188_v8 = vpop.f32.mrb[5].mxu0 }
 0x102   :  { %v300_v9 = vadd.f32 %v299_v7, %v693_v50  ;;  %v189_v10 = vadd.f32 %v188_v8, %v695_v51  ;;  %v301_v11 = vpop.f32.mrb[5].mxu1 }
 0x103   :  { %342 = vst [vmem:[%s830_s3 + $0x40] sm:$0xff] %v187_v6  ;;  %v302_v12 = vadd.f32 %v301_v11, %v697_v52 }
 0x104   :  { %344 = vst [vmem:[%s830_s3 + $0x50] sm:$0xff] %v300_v9  ;;  %343 = vst [vmem:[%s830_s3 + $0x48] sm:$0xff] %v189_v10  ;;  %v192_v13 = vpop.f32.mrb[6].mxu0 }
 0x105   :  { %345 = vst [vmem:[%s830_s3 + $0x58] sm:$0xff] %v302_v12  ;;  %v193_v14 = vadd.f32 %v192_v13, %v691_v49  ;;  %v305_v15 = vpop.f32.mrb[6].mxu1  ;;  %v194_v16 = vpop.f32.mrb[7].mxu0 }
 0x106   :  { %v306_v17 = vadd.f32 %v305_v15, %v693_v50  ;;  %v195_v18 = vadd.f32 %v194_v16, %v695_v51  ;;  %v307_v19 = vpop.f32.mrb[7].mxu1 }
 0x107   :  { %346 = vst [vmem:[%s830_s3 + $0x60] sm:$0xff] %v193_v14  ;;  %v308_v20 = vadd.f32 %v307_v19, %v697_v52 }
 0x108   :  { %348 = vst [vmem:[%s830_s3 + $0x70] sm:$0xff] %v306_v17  ;;  %347 = vst [vmem:[%s830_s3 + $0x68] sm:$0xff] %v195_v18  ;;  %v198_v21 = vpop.f32.mrb[8].mxu0 }
 0x109   :  { %349 = vst [vmem:[%s830_s3 + $0x78] sm:$0xff] %v308_v20  ;;  %v199_v22 = vadd.f32 %v198_v21, %v691_v49  ;;  %v311_v23 = vpop.f32.mrb[8].mxu1  ;;  %v200_v24 = vpop.f32.mrb[9].mxu0 }
 0x10a   :  { %v312_v25 = vadd.f32 %v311_v23, %v693_v50  ;;  %v201_v26 = vadd.f32 %v200_v24, %v695_v51  ;;  %v313_v27 = vpop.f32.mrb[9].mxu1 }
 0x10b   :  { %350 = vst [vmem:[%s830_s3 + $0x80] sm:$0xff] %v199_v22  ;;  %v314_v28 = vadd.f32 %v313_v27, %v697_v52 }
 0x10c   :  { %352 = vst [vmem:[%s830_s3 + $0x90] sm:$0xff] %v312_v25  ;;  %351 = vst [vmem:[%s830_s3 + $0x88] sm:$0xff] %v201_v26  ;;  %v204_v29 = vpop.f32.mrb[10].mxu0 }
 0x10d   :  { %353 = vst [vmem:[%s830_s3 + $0x98] sm:$0xff] %v314_v28  ;;  %v205_v30 = vadd.f32 %v204_v29, %v691_v49  ;;  %v317_v31 = vpop.f32.mrb[10].mxu1  ;;  %v206_v32 = vpop.f32.mrb[11].mxu0 }
 0x10e   :  { %v318_v33 = vadd.f32 %v317_v31, %v693_v50  ;;  %v207_v34 = vadd.f32 %v206_v32, %v695_v51  ;;  %v319_v35 = vpop.f32.mrb[11].mxu1 }
 0x10f   :  { %354 = vst [vmem:[%s830_s3 + $0xa0] sm:$0xff] %v205_v30  ;;  %v320_v36 = vadd.f32 %v319_v35, %v697_v52 }
 0x110   :  { %356 = vst [vmem:[%s830_s3 + $0xb0] sm:$0xff] %v318_v33  ;;  %355 = vst [vmem:[%s830_s3 + $0xa8] sm:$0xff] %v207_v34  ;;  %v210_v37 = vpop.f32.mrb[12].mxu0 }
 0x111   :  { %357 = vst [vmem:[%s830_s3 + $0xb8] sm:$0xff] %v320_v36  ;;  %v211_v38 = vadd.f32 %v210_v37, %v691_v49  ;;  %v323_v39 = vpop.f32.mrb[12].mxu1  ;;  %v212_v40 = vpop.f32.mrb[13].mxu0 }
 0x112   :  { %v324_v41 = vadd.f32 %v323_v39, %v693_v50  ;;  %v213_v42 = vadd.f32 %v212_v40, %v695_v51  ;;  %v325_v43 = vpop.f32.mrb[13].mxu1 }
 0x113   :  { %358 = vst [vmem:[%s830_s3 + $0xc0] sm:$0xff] %v211_v38  ;;  %v326_v44 = vadd.f32 %v325_v43, %v697_v52 }
 0x114   :  { %360 = vst [vmem:[%s830_s3 + $0xd0] sm:$0xff] %v324_v41  ;;  %359 = vst [vmem:[%s830_s3 + $0xc8] sm:$0xff] %v213_v42  ;;  %v216_v45 = vpop.f32.mrb[14].mxu0 }
 0x115   :  { %361 = vst [vmem:[%s830_s3 + $0xd8] sm:$0xff] %v326_v44  ;;  %v217_v46 = vadd.f32 %v216_v45, %v691_v49  ;;  %v329_v47 = vpop.f32.mrb[14].mxu1  ;;  %v218_v48 = vpop.f32.mrb[15].mxu0 }
 0x116   :  { %v330_v3 = vadd.f32 %v329_v47, %v693_v50  ;;  %v219_v53 = vadd.f32 %v218_v48, %v695_v51  ;;  %v331_v54 = vpop.f32.mrb[15].mxu1 }
 0x117   :  { %362 = vst [vmem:[%s830_s3 + $0xe0] sm:$0xff] %v217_v46  ;;  %v332_v55 = vadd.f32 %v331_v54, %v697_v52 }
 0x118   :  { %364 = vst [vmem:[%s830_s3 + $0xf0] sm:$0xff] %v330_v3  ;;  %363 = vst [vmem:[%s830_s3 + $0xe8] sm:$0xff] %v219_v53 }
 0x119   :  { %365 = vst [vmem:[%s830_s3 + $0xf8] sm:$0xff] %v332_v55 }

// kernel: lstm_model_forward.6
= control target key start
LH: loop header
LB: loop body
LE: loop exit
PB: predicated region body
PF: predicated region fallthrough
CT: control target
= control target key end

     0   :  { %v2662_v3 = vmov 0.0   ;;  %s3693_s3 = inlined_call_operand.vmem [shape: f32[128,512], index: 3, kind: input, shape index: {}]   ;;  %s3694_s1 = inlined_call_operand.vmem [shape: f32[8,128], index: 1, kind: input, shape index: {}]   ;;  %s3695_s0 = inlined_call_operand.vmem [shape: f32[8,8,512], index: 0, kind: input, shape index: {}]   ;;  %s3696_s2 = inlined_call_operand.vmem [shape: f32[8,128], index: 2, kind: input, shape index: {}]   ;;  %s3697_s4 = inlined_call_operand.vmem [shape: f32[8,8,128], index: 4, kind: output, shape index: {0}]   ;;  %s3698_s6 = inlined_call_operand.vmem [shape: f32[8,128], index: 6, kind: output, shape index: {2}]   ;;  %s3699_s5 = inlined_call_operand.vmem [shape: f32[8,128], index: 5, kind: output, shape index: {1}]  }
   0x1   :  { %v27_v0 = vld [vmem:[%s3693_s3 + $0x8] sm:$0xff]  ;;  %v26_v2 = vld [vmem:[%s3693_s3] sm:$0xff]  ;;  %154 = vmatprep.mubr.f32.mxu0 %v2662_v3  ;;  %225 = vmatprep.mubr.f32.mxu1 %v2662_v3  ;;  %v29_v19 = vld [vmem:[%s3693_s3 + $0x18] sm:$0xff] }
   0x2   :  { %v31_v1 = vld [vmem:[%s3693_s3 + $0x28] sm:$0xff]  ;;  %v30_v5 = vld [vmem:[%s3693_s3 + $0x20] sm:$0xff]  ;;  %v33_v20 = vld [vmem:[%s3693_s3 + $0x38] sm:$0xff] }
   0x3   :  { %v2709_v4 = vpack.c.bf16 %v31_v1, %v27_v0  ;;  %v35_v6 = vld [vmem:[%s3693_s3 + $0x48] sm:$0xff]  ;;  %v2720_v8 = vpack.c.bf16 %v30_v5, %v26_v2  ;;  %v34_v10 = vld [vmem:[%s3693_s3 + $0x40] sm:$0xff]  ;;  %v2761_v22 = vpack.c.bf16 %v33_v20, %v29_v19  ;;  %v28_v23 = vld [vmem:[%s3693_s3 + $0x10] sm:$0xff] }
   0x4   :  { %v39_v7 = vld [vmem:[%s3693_s3 + $0x68] sm:$0xff]  ;;  %v38_v11 = vld [vmem:[%s3693_s3 + $0x60] sm:$0xff]  ;;  %v32_v24 = vld [vmem:[%s3693_s3 + $0x30] sm:$0xff] }
   0x5   :  { %v2722_v9 = vpack.c.bf16 %v39_v7, %v35_v6  ;;  %v43_v12 = vld [vmem:[%s3693_s3 + $0x88] sm:$0xff]  ;;  %2022 = vmatprep.subr.bf16.mxu0 %v2709_v4  ;;  %v2738_v14 = vpack.c.bf16 %v38_v11, %v34_v10  ;;  %v42_v15 = vld [vmem:[%s3693_s3 + $0x80] sm:$0xff]  ;;  %v2769_v25 = vpack.c.bf16 %v32_v24, %v28_v23  ;;  %2054 = vmatprep.subr.bf16.mxu1 %v2761_v22  ;;  %v37_v27 = vld [vmem:[%s3693_s3 + $0x58] sm:$0xff] }
   0x6   :  { %v47_v13 = vld [vmem:[%s3693_s3 + $0xa8] sm:$0xff]  ;;  %2024 = vmatpush1.bf16.msra.mxu0 %v2720_v8  ;;  %v46_v16 = vld [vmem:[%s3693_s3 + $0xa0] sm:$0xff]  ;;  %v41_v28 = vld [vmem:[%s3693_s3 + $0x78] sm:$0xff] }
   0x7   :  { %2026 = vmatprep.subr.bf16.mxu0 %v2722_v9  ;;  %v2747_v17 = vpack.c.bf16 %v47_v13, %v43_v12  ;;  %v51_v18 = vld [vmem:[%s3693_s3 + $0xc8] sm:$0xff]  ;;  %v2772_v26 = vpack.c.bf16 %v46_v16, %v42_v15  ;;  %v36_v29 = vld [vmem:[%s3693_s3 + $0x50] sm:$0xff]  ;;  %v50_v31 = vld [vmem:[%s3693_s3 + $0xc0] sm:$0xff]  ;;  %2056 = vmatpush1.bf16.msra.mxu1 %v2769_v25  ;;  %v2794_v33 = vpack.c.bf16 %v41_v28, %v37_v27 }
   0x8   :  { %v55_v21 = vld [vmem:[%s3693_s3 + $0xe8] sm:$0xff]  ;;  %v54_v32 = vld [vmem:[%s3693_s3 + $0xe0] sm:$0xff]  ;;  %v40_v34 = vld [vmem:[%s3693_s3 + $0x70] sm:$0xff] }
   0x9   :  { %v2785_v30 = vpack.c.bf16 %v55_v21, %v51_v18  ;;  %v59_v35 = vld [vmem:[%s3693_s3 + $0x108] sm:$0xff]  ;;  %v2805_v37 = vpack.c.bf16 %v40_v34, %v36_v29  ;;  %v45_v38 = vld [vmem:[%s3693_s3 + $0x98] sm:$0xff]  ;;  %2058 = vmatprep.subr.bf16.mxu1 %v2794_v33  ;;  %v44_v40 = vld [vmem:[%s3693_s3 + $0x90] sm:$0xff]  ;;  %v2821_v42 = vpack.c.bf16 %v54_v32, %v50_v31 }
   0xa   :  { %2028 = vmatpush1.bf16.msra.mxu0 %v2738_v14  ;;  %v63_v36 = vld [vmem:[%s3693_s3 + $0x128] sm:$0xff]  ;;  %v49_v39 = vld [vmem:[%s3693_s3 + $0xb8] sm:$0xff]  ;;  %v48_v41 = vld [vmem:[%s3693_s3 + $0xb0] sm:$0xff] }
   0xb   :  { %2030 = vmatprep.subr.bf16.mxu0 %v2747_v17  ;;  %v58_v43 = vld [vmem:[%s3693_s3 + $0x100] sm:$0xff]  ;;  %v2829_v45 = vpack.c.bf16 %v49_v39, %v45_v38  ;;  %v2832_v46 = vpack.c.bf16 %v63_v36, %v59_v35  ;;  %2060 = vmatpush1.bf16.msra.mxu1 %v2805_v37  ;;  %v67_v47 = vld [vmem:[%s3693_s3 + $0x148] sm:$0xff]  ;;  %v2838_v48 = vpack.c.bf16 %v48_v41, %v44_v40  ;;  %v53_v49 = vld [vmem:[%s3693_s3 + $0xd8] sm:$0xff] }
   0xc   :  { %v62_v44 = vld [vmem:[%s3693_s3 + $0x120] sm:$0xff]  ;;  %v57_v50 = vld [vmem:[%s3693_s3 + $0xf8] sm:$0xff]  ;;  %v71_v51 = vld [vmem:[%s3693_s3 + $0x168] sm:$0xff] }
   0xd   :  { %2062 = vmatprep.subr.bf16.mxu1 %v2829_v45  ;;  %v2850_v52 = vpack.c.bf16 %v57_v50, %v53_v49  ;;  %v52_v53 = vld [vmem:[%s3693_s3 + $0xd0] sm:$0xff]  ;;  %v2859_v55 = vpack.c.bf16 %v62_v44, %v58_v43  ;;  %v61_v56 = vld [vmem:[%s3693_s3 + $0x118] sm:$0xff]  ;;  %v2868_v58 = vpack.c.bf16 %v71_v51, %v67_v47  ;;  %v66_v59 = vld [vmem:[%s3693_s3 + $0x140] sm:$0xff] }
   0xe   :  { %2032 = vmatpush1.bf16.msra.mxu0 %v2772_v26  ;;  %v56_v54 = vld [vmem:[%s3693_s3 + $0xf0] sm:$0xff]  ;;  %v65_v57 = vld [vmem:[%s3693_s3 + $0x138] sm:$0xff]  ;;  %v70_v60 = vld [vmem:[%s3693_s3 + $0x160] sm:$0xff] }
   0xf   :  { %2034 = vmatprep.subr.bf16.mxu0 %v2785_v30  ;;  %2064 = vmatpush1.bf16.msra.mxu1 %v2838_v48  ;;  %v75_v61 = vld [vmem:[%s3693_s3 + $0x188] sm:$0xff]  ;;  %v2880_v62 = vpack.c.bf16 %v56_v54, %v52_v53  ;;  %v2886_v0 = vpack.c.bf16 %v65_v57, %v61_v56  ;;  %v60_v1 = vld [vmem:[%s3693_s3 + $0x110] sm:$0xff]  ;;  %v69_v5 = vld [vmem:[%s3693_s3 + $0x158] sm:$0xff]  ;;  %v2901_v7 = vpack.c.bf16 %v70_v60, %v66_v59 }
  0x10   :  { %v79_v63 = vld [vmem:[%s3693_s3 + $0x1a8] sm:$0xff]  ;;  %2066 = vmatprep.subr.bf16.mxu1 %v2850_v52  ;;  %v64_v2 = vld [vmem:[%s3693_s3 + $0x130] sm:$0xff]  ;;  %v73_v6 = vld [vmem:[%s3693_s3 + $0x178] sm:$0xff] }
  0x11   :  { %v2904_v10 = vpack.c.bf16 %v79_v63, %v75_v61  ;;  %v74_v11 = vld [vmem:[%s3693_s3 + $0x180] sm:$0xff]  ;;  %v83_v13 = vld [vmem:[%s3693_s3 + $0x1c8] sm:$0xff]  ;;  %v2916_v15 = vpack.c.bf16 %v64_v2, %v60_v1  ;;  %v2922_v18 = vpack.c.bf16 %v73_v6, %v69_v5  ;;  %v68_v19 = vld [vmem:[%s3693_s3 + $0x150] sm:$0xff] }
  0x12   :  { %2036 = vmatpush1.bf16.msra.mxu0 %v2821_v42  ;;  %v78_v12 = vld [vmem:[%s3693_s3 + $0x1a0] sm:$0xff]  ;;  %v87_v16 = vld [vmem:[%s3693_s3 + $0x1e8] sm:$0xff]  ;;  %v72_v20 = vld [vmem:[%s3693_s3 + $0x170] sm:$0xff] }
  0x13   :  { %2038 = vmatprep.subr.bf16.mxu0 %v2832_v46  ;;  %2068 = vmatpush1.bf16.msra.mxu1 %v2880_v62  ;;  %v77_v21 = vld [vmem:[%s3693_s3 + $0x198] sm:$0xff]  ;;  %v2937_v24 = vpack.c.bf16 %v78_v12, %v74_v11  ;;  %v2940_v27 = vpack.c.bf16 %v87_v16, %v83_v13  ;;  %v82_v28 = vld [vmem:[%s3693_s3 + $0x1c0] sm:$0xff]  ;;  %v2949_v31 = vpack.c.bf16 %v72_v20, %v68_v19  ;;  %v76_v34 = vld [vmem:[%s3693_s3 + $0x190] sm:$0xff] }
  0x14   :  { %2070 = vmatprep.subr.bf16.mxu1 %v2886_v0  ;;  %v81_v23 = vld [vmem:[%s3693_s3 + $0x1b8] sm:$0xff]  ;;  %v86_v29 = vld [vmem:[%s3693_s3 + $0x1e0] sm:$0xff]  ;;  %v80_v35 = vld [vmem:[%s3693_s3 + $0x1b0] sm:$0xff] }
  0x15   :  { %v2952_v32 = vpack.c.bf16 %v81_v23, %v77_v21  ;;  %v85_v36 = vld [vmem:[%s3693_s3 + $0x1d8] sm:$0xff]  ;;  %v2967_v39 = vpack.c.bf16 %v86_v29, %v82_v28  ;;  %v2971_v40 = vpack.c.bf16 %v80_v35, %v76_v34  ;;  %v84_v43 = vld [vmem:[%s3693_s3 + $0x1d0] sm:$0xff]  ;;  %v20_v47 = vld [vmem:[%s3694_s1] sm:$0xff] }
  0x16   :  { %2040 = vmatpush1.bf16.msra.mxu0 %v2859_v55  ;;  %v89_v38 = vld [vmem:[%s3693_s3 + $0x1f8] sm:$0xff]  ;;  %v88_v44 = vld [vmem:[%s3693_s3 + $0x1f0] sm:$0xff]  ;;  %v22_v50 = vld [vmem:[%s3695_s0] sm:$0xff] }
  0x17   :  { %2042 = vmatprep.subr.bf16.mxu0 %v2868_v58  ;;  %2072 = vmatpush1.bf16.msra.mxu1 %v2916_v15  ;;  %v2974_v41 = vpack.c.bf16 %v89_v38, %v85_v36  ;;  %v2987_v49 = vpack.c.bf16 %v88_v44, %v84_v43  ;;  %v23_v51 = vld [vmem:[%s3695_s0 + $0x8] sm:$0xff]  ;;  %v25_v61 = vld [vmem:[%s3695_s0 + $0x18] sm:$0xff]  ;;  %v24_v5 = vld [vmem:[%s3695_s0 + $0x10] sm:$0xff] }
  0x18   :  { %2074 = vmatprep.subr.bf16.mxu1 %v2922_v18  ;;  %v21_v23 = vld [vmem:[%s3696_s2] sm:$0xff] }
  0x1a   :  { %2044 = vmatpush1.bf16.msra.mxu0 %v2901_v7 }
  0x1b   :  { %2046 = vmatprep.subr.bf16.mxu0 %v2904_v10  ;;  %2076 = vmatpush1.bf16.msra.mxu1 %v2949_v31 }
  0x1c   :  { %2078 = vmatprep.subr.bf16.mxu1 %v2952_v32 }
  0x1e   :  { %2048 = vmatpush1.bf16.msra.mxu0 %v2937_v24 }
  0x1f   :  { %2050 = vmatprep.subr.bf16.mxu0 %v2940_v27  ;;  %2080 = vmatpush1.bf16.msra.mxu1 %v2971_v40 }
  0x20   :  { %2082 = vmatprep.subr.bf16.mxu1 %v2974_v41 }
  0x22   :  { %2052 = vmatpush1.bf16.msra.mxu0 %v2967_v39 }
  0x23   :  { %2086 = vmatprep.subr.bf16.mxu0 %v2709_v4  ;;  %2084 = vmatpush1.bf16.msra.mxu1 %v2987_v49 }
  0x24   :  { %2118 = vmatprep.subr.bf16.mxu1 %v2761_v22 }
  0x25   :  { %155 = vmatmul.mubr.f32.vlgmr.msra.gmra.mrb[0].mxu0 %v20_v47 }
  0x26   :  { %2088 = vmatpush1.bf16.msra.mxu0 %v2720_v8  ;;  %394 = vmatprep.mubr.f32.mxu0 %v2662_v3 }
  0x27   :  { %2090 = vmatprep.subr.bf16.mxu0 %v2722_v9  ;;  %226 = vmatmul.mubr.f32.vlgmr.msra.gmra.mrb[0].mxu1 %v20_v47 }
  0x28   :  { %2120 = vmatpush1.bf16.msra.mxu1 %v2769_v25  ;;  %465 = vmatprep.mubr.f32.mxu1 %v2662_v3 }
  0x29   :  { %2122 = vmatprep.subr.bf16.mxu1 %v2794_v33 }
  0x2a   :  { %2092 = vmatpush1.bf16.msra.mxu0 %v2738_v14 }
  0x2b   :  { %2094 = vmatprep.subr.bf16.mxu0 %v2747_v17 }
  0x2c   :  { %2124 = vmatpush1.bf16.msra.mxu1 %v2805_v37 }
  0x2d   :  { %2126 = vmatprep.subr.bf16.mxu1 %v2829_v45 }
  0x2e   :  { %2096 = vmatpush1.bf16.msra.mxu0 %v2772_v26 }
  0x2f   :  { %2098 = vmatprep.subr.bf16.mxu0 %v2785_v30 }
  0x30   :  { %2128 = vmatpush1.bf16.msra.mxu1 %v2838_v48 }
  0x31   :  { %2130 = vmatprep.subr.bf16.mxu1 %v2850_v52 }
  0x32   :  { %2100 = vmatpush1.bf16.msra.mxu0 %v2821_v42 }
  0x33   :  { %2102 = vmatprep.subr.bf16.mxu0 %v2832_v46 }
  0x34   :  { %2132 = vmatpush1.bf16.msra.mxu1 %v2880_v62 }
  0x35   :  { %2134 = vmatprep.subr.bf16.mxu1 %v2886_v0 }
  0x36   :  { %2104 = vmatpush1.bf16.msra.mxu0 %v2859_v55 }
  0x37   :  { %2106 = vmatprep.subr.bf16.mxu0 %v2868_v58 }
  0x38   :  { %2136 = vmatpush1.bf16.msra.mxu1 %v2916_v15 }
  0x39   :  { %2138 = vmatprep.subr.bf16.mxu1 %v2922_v18 }
  0x3a   :  { %2108 = vmatpush1.bf16.msra.mxu0 %v2901_v7 }
  0x3b   :  { %2110 = vmatprep.subr.bf16.mxu0 %v2904_v10 }
  0x3c   :  { %2140 = vmatpush1.bf16.msra.mxu1 %v2949_v31 }
  0x3d   :  { %2142 = vmatprep.subr.bf16.mxu1 %v2952_v32 }
  0x3e   :  { %2112 = vmatpush1.bf16.msra.mxu0 %v2937_v24 }
  0x3f   :  { %2114 = vmatprep.subr.bf16.mxu0 %v2940_v27 }
  0x40   :  { %2144 = vmatpush1.bf16.msra.mxu1 %v2971_v40 }
  0x41   :  { %2146 = vmatprep.subr.bf16.mxu1 %v2974_v41 }
  0x42   :  { %2116 = vmatpush1.bf16.msra.mxu0 %v2967_v39 }
  0x43   :  { %2150 = vmatprep.subr.bf16.mxu0 %v2709_v4 }
  0x44   :  { %2148 = vmatpush1.bf16.msra.mxu1 %v2987_v49 }
  0x45   :  { %2182 = vmatprep.subr.bf16.mxu1 %v2761_v22 }
  0xf8   :  { %v156_v53 = vpop.f32.mrb[0].mxu0 }
  0xf9   :  { %v232_v54 = vadd.f32 %v156_v53, %v22_v50  ;;  %v158_v56 = vpop.f32.mrb[1].mxu0 }
  0xfa   :  { %v233_v57 = vadd.f32 %v158_v56, %v23_v51  ;;  %v227_v63 = vpop.f32.mrb[0].mxu1 }
  0xfb   :  { %v1962_v59 = vmul.f32 -1.442695, %v232_v54  ;;  %v229_v1 = vpop.f32.mrb[1].mxu1  ;;  %v234_v11 = vadd.f32 %v227_v63, %v24_v5 }
  0xfc   :  { %v1963_v60 = vmul.f32 -1.442695, %v233_v57  ;;  %v235_v2 = vadd.f32 %v229_v1, %v25_v61 }
  0xfd   :  { %2534 = vpow2.f32 %v1962_v59 }
  0xfe   :  { %2536 = vpow2.f32 %v1963_v60  ;;  %v1964_v6 = vmul.f32 -1.442695, %v235_v2 }
 0x100   :  { %2538 = vpow2.f32 %v1964_v6 }
 0x101   :  { %2540 = vtanh.f32 %v234_v11 }
 0x107   :  { %v2535_v12 = vpop.eup %2534 }
 0x108   :  { %v2537_v13 = vpop.eup %2536  ;;  %v239_v16 = vadd.f32 1.0, %v2535_v12 }
 0x109   :  { %v245_v19 = vadd.f32 1.0, %v2537_v13 }
 0x10a   :  { %2542 = vrcp.f32 %v239_v16  ;;  %v2539_v20 = vpop.eup %2538  ;;  %v792_v16 = vld [vmem:[%s3693_s3 + $0x160] sm:$0xff] }
 0x10b   :  { %2544 = vrcp.f32 %v245_v19  ;;  %v2541_v21 = vpop.eup %2540  ;;  %v252_v29 = vadd.f32 1.0, %v2539_v20  ;;  %v797_v19 = vld [vmem:[%s3693_s3 + $0x188] sm:$0xff] }
 0x10c   :  { %v801_v20 = vld [vmem:[%s3693_s3 + $0x1a8] sm:$0xff] }
 0x10d   :  { %2546 = vrcp.f32 %v252_v29  ;;  %v800_v29 = vld [vmem:[%s3693_s3 + $0x1a0] sm:$0xff] }
 0x114   :  { %v2543_v28 = vpop.eup %2542 }
 0x115   :  { %v2545_v34 = vpop.eup %2544  ;;  %v256_v35 = vmul.f32 %v2543_v28, %v2541_v21  ;;  %v796_v28 = vld [vmem:[%s3693_s3 + $0x180] sm:$0xff] }
 0x116   :  { %v255_v36 = vmul.f32 %v2545_v34, %v21_v23  ;;  %v3189_v23 = vpack.c.bf16 %v801_v20, %v797_v19  ;;  %v805_v34 = vld [vmem:[%s3693_s3 + $0x1c8] sm:$0xff]  ;;  %v1000_v19 = vld [vmem:[%s3693_s3 + $0x58] sm:$0xff] }
 0x117   :  { %v2547_v43 = vpop.eup %2546 }
 0x118   :  { %v3042_v38 = vadd.f32 %v256_v35, %v255_v36  ;;  %v809_v35 = vld [vmem:[%s3693_s3 + $0x1e8] sm:$0xff]  ;;  %v3205_v36 = vpack.c.bf16 %v800_v29, %v796_v28  ;;  %v1004_v28 = vld [vmem:[%s3693_s3 + $0x78] sm:$0xff]  ;;  %v997_v29 = vld [vmem:[%s3693_s3 + $0x40] sm:$0xff] }
 0x11a   :  { %2548 = vtanh.f32 %v3042_v38 }
 0x124   :  { %v2549_v44 = vpop.eup %2548 }
 0x125   :  { %v259_v47 = vmul.f32 %v2549_v44, %v2547_v43  ;;  %v804_v43 = vld [vmem:[%s3693_s3 + $0x1c0] sm:$0xff] }
 0x126   :  { %v808_v44 = vld [vmem:[%s3693_s3 + $0x1e0] sm:$0xff] }
 0x127   :  { %260 = vst [vmem:[%s3697_s4] sm:$0xff] %v259_v47  ;;  %395 = vmatmul.mubr.f32.vlgmr.msra.gmra.mrb[2].mxu0 %v259_v47  ;;  %466 = vmatmul.mubr.f32.vlgmr.msra.gmra.mrb[2].mxu1 %v259_v47  ;;  %v3217_v47 = vpack.c.bf16 %v808_v44, %v804_v43  ;;  %v999_v44 = vld [vmem:[%s3693_s3 + $0x50] sm:$0xff] }
 0x128   :  { %2152 = vmatpush1.bf16.msra.mxu0 %v2720_v8  ;;  %2184 = vmatpush1.bf16.msra.mxu1 %v2769_v25 }
 0x129   :  { %2154 = vmatprep.subr.bf16.mxu0 %v2722_v9  ;;  %2186 = vmatprep.subr.bf16.mxu1 %v2794_v33 }
 0x12a   :  { %635 = vmatprep.mubr.f32.mxu0 %v2662_v3  ;;  %706 = vmatprep.mubr.f32.mxu1 %v2662_v3 }
 0x12c   :  { %2156 = vmatpush1.bf16.msra.mxu0 %v2738_v14  ;;  %2188 = vmatpush1.bf16.msra.mxu1 %v2805_v37 }
 0x12d   :  { %2158 = vmatprep.subr.bf16.mxu0 %v2747_v17  ;;  %2190 = vmatprep.subr.bf16.mxu1 %v2829_v45 }
 0x130   :  { %2160 = vmatpush1.bf16.msra.mxu0 %v2772_v26  ;;  %2192 = vmatpush1.bf16.msra.mxu1 %v2838_v48  ;;  %v1965_v26 = vld [vmem:[%s3695_s0 + $0x20] sm:$0xff] }
 0x131   :  { %2162 = vmatprep.subr.bf16.mxu0 %v2785_v30  ;;  %2194 = vmatprep.subr.bf16.mxu1 %v2850_v52  ;;  %v1966_v30 = vld [vmem:[%s3695_s0 + $0x28] sm:$0xff] }
 0x134   :  { %2164 = vmatpush1.bf16.msra.mxu0 %v2821_v42  ;;  %2196 = vmatpush1.bf16.msra.mxu1 %v2880_v62 }
 0x135   :  { %2166 = vmatprep.subr.bf16.mxu0 %v2832_v46  ;;  %2198 = vmatprep.subr.bf16.mxu1 %v2886_v0 }
 0x138   :  { %2168 = vmatpush1.bf16.msra.mxu0 %v2859_v55  ;;  %2200 = vmatpush1.bf16.msra.mxu1 %v2916_v15 }
 0x139   :  { %2170 = vmatprep.subr.bf16.mxu0 %v2868_v58  ;;  %2202 = vmatprep.subr.bf16.mxu1 %v2922_v18 }
 0x13c   :  { %2172 = vmatpush1.bf16.msra.mxu0 %v2901_v7  ;;  %2204 = vmatpush1.bf16.msra.mxu1 %v2949_v31 }
 0x13d   :  { %2174 = vmatprep.subr.bf16.mxu0 %v2904_v10  ;;  %2206 = vmatprep.subr.bf16.mxu1 %v2952_v32 }
 0x140   :  { %2176 = vmatpush1.bf16.msra.mxu0 %v2937_v24  ;;  %2208 = vmatpush1.bf16.msra.mxu1 %v2971_v40 }
 0x141   :  { %2178 = vmatprep.subr.bf16.mxu0 %v2940_v27  ;;  %2210 = vmatprep.subr.bf16.mxu1 %v2974_v41 }
 0x144   :  { %2180 = vmatpush1.bf16.msra.mxu0 %v2967_v39  ;;  %2212 = vmatpush1.bf16.msra.mxu1 %v2987_v49  ;;  %v1967_v39 = vld [vmem:[%s3695_s0 + $0x30] sm:$0xff] }
 0x145   :  { %2214 = vmatprep.subr.bf16.mxu0 %v2709_v4  ;;  %2246 = vmatprep.subr.bf16.mxu1 %v2761_v22  ;;  %v1968_v4 = vld [vmem:[%s3695_s0 + $0x38] sm:$0xff] }
 0x1fa   :  { %v396_v42 = vpop.f32.mrb[2].mxu0  ;;  %v467_v46 = vpop.f32.mrb[2].mxu1 }
 0x1fb   :  { %v472_v55 = vadd.f32 %v1965_v26, %v396_v42  ;;  %v398_v58 = vpop.f32.mrb[3].mxu0  ;;  %v469_v7 = vpop.f32.mrb[3].mxu1  ;;  %v474_v51 = vadd.f32 %v1967_v39, %v467_v46  ;;  %v1973_v26 = vld [vmem:[%s3695_s0 + $0x40] sm:$0xff]  ;;  %v1975_v39 = vld [vmem:[%s3695_s0 + $0x50] sm:$0xff] }
 0x1fc   :  { %v473_v10 = vadd.f32 %v1966_v30, %v398_v58  ;;  %v475_v22 = vadd.f32 %v1968_v4, %v469_v7  ;;  %v1974_v30 = vld [vmem:[%s3695_s0 + $0x48] sm:$0xff]  ;;  %v1976_v4 = vld [vmem:[%s3695_s0 + $0x58] sm:$0xff] }
 0x1fd   :  { %v1969_v24 = vmul.f32 -1.442695, %v472_v55 }
 0x1fe   :  { %v1970_v27 = vmul.f32 -1.442695, %v473_v10  ;;  %v1971_v50 = vmul.f32 -1.442695, %v475_v22 }
 0x1ff   :  { %2550 = vpow2.f32 %v1969_v24 }
 0x200   :  { %2552 = vpow2.f32 %v1970_v27 }
 0x201   :  { %2554 = vpow2.f32 %v1971_v50 }
 0x202   :  { %2556 = vtanh.f32 %v474_v51 }
 0x209   :  { %v2551_v53 = vpop.eup %2550 }
 0x20a   :  { %v2553_v54 = vpop.eup %2552  ;;  %v479_v56 = vadd.f32 1.0, %v2551_v53 }
 0x20b   :  { %v485_v57 = vadd.f32 1.0, %v2553_v54  ;;  %v2555_v59 = vpop.eup %2554 }
 0x20c   :  { %2558 = vrcp.f32 %v479_v56  ;;  %v2557_v60 = vpop.eup %2556  ;;  %v492_v2 = vadd.f32 1.0, %v2555_v59 }
 0x20d   :  { %2560 = vrcp.f32 %v485_v57 }
 0x20e   :  { %2562 = vrcp.f32 %v492_v2 }
 0x216   :  { %v2559_v61 = vpop.eup %2558 }
 0x217   :  { %v2561_v63 = vpop.eup %2560  ;;  %v496_v1 = vmul.f32 %v2559_v61, %v2557_v60 }
 0x218   :  { %v495_v5 = vmul.f32 %v2561_v63, %v3042_v38  ;;  %v2563_v11 = vpop.eup %2562  ;;  %v3208_v38 = vpack.c.bf16 %v809_v35, %v805_v34  ;;  %v1001_v34 = vld [vmem:[%s3693_s3 + $0x60] sm:$0xff]  ;;  %v3298_v35 = vpack.c.bf16 %v1004_v28, %v1000_v19  ;;  %v1051_v19 = vld [vmem:[%s3693_s3 + $0x1f0] sm:$0xff] }
 0x219   :  { %v3300_v43 = vpack.c.bf16 %v1001_v34, %v997_v29  ;;  %v1981_v29 = vld [vmem:[%s3695_s0 + $0x60] sm:$0xff]  ;;  %v1982_v34 = vld [vmem:[%s3695_s0 + $0x68] sm:$0xff] }
 0x21a   :  { %v3095_v6 = vadd.f32 %v496_v1, %v495_v5 }
 0x21c   :  { %2564 = vtanh.f32 %v3095_v6 }
 0x226   :  { %v2565_v12 = vpop.eup %2564 }
 0x227   :  { %v499_v13 = vmul.f32 %v2565_v12, %v2563_v11 }
 0x229   :  { %1972 = vst [vmem:[%s3697_s4 + $0x8] sm:$0xff] %v499_v13  ;;  %636 = vmatmul.mubr.f32.vlgmr.msra.gmra.mrb[4].mxu0 %v499_v13  ;;  %707 = vmatmul.mubr.f32.vlgmr.msra.gmra.mrb[4].mxu1 %v499_v13 }
 0x22a   :  { %2216 = vmatpush1.bf16.msra.mxu0 %v2720_v8  ;;  %2248 = vmatpush1.bf16.msra.mxu1 %v2769_v25  ;;  %v764_v8 = vld [vmem:[%s3693_s3 + $0x80] sm:$0xff]  ;;  %v777_v25 = vld [vmem:[%s3693_s3 + $0xe8] sm:$0xff] }
 0x22b   :  { %2218 = vmatprep.subr.bf16.mxu0 %v2722_v9  ;;  %2250 = vmatprep.subr.bf16.mxu1 %v2794_v33  ;;  %v768_v9 = vld [vmem:[%s3693_s3 + $0xa0] sm:$0xff] }
 0x22c   :  { %876 = vmatprep.mubr.f32.mxu0 %v2662_v3  ;;  %947 = vmatprep.mubr.f32.mxu1 %v2662_v3 }
 0x22e   :  { %2220 = vmatpush1.bf16.msra.mxu0 %v2738_v14  ;;  %2252 = vmatpush1.bf16.msra.mxu1 %v2805_v37  ;;  %v3128_v14 = vpack.c.bf16 %v768_v9, %v764_v8  ;;  %v772_v37 = vld [vmem:[%s3693_s3 + $0xc0] sm:$0xff]  ;;  %v994_v9 = vld [vmem:[%s3693_s3 + $0x28] sm:$0xff] }
 0x22f   :  { %2222 = vmatprep.subr.bf16.mxu0 %v2747_v17  ;;  %2254 = vmatprep.subr.bf16.mxu1 %v2829_v45  ;;  %v773_v17 = vld [vmem:[%s3693_s3 + $0xc8] sm:$0xff]  ;;  %v776_v45 = vld [vmem:[%s3693_s3 + $0xe0] sm:$0xff] }
 0x230   :  { %v3137_v33 = vpack.c.bf16 %v777_v25, %v773_v17  ;;  %v992_v17 = vld [vmem:[%s3693_s3 + $0x18] sm:$0xff] }
 0x232   :  { %2256 = vmatpush1.bf16.msra.mxu1 %v2838_v48  ;;  %2224 = vmatpush1.bf16.msra.mxu0 %v3128_v14  ;;  %v3145_v48 = vpack.c.bf16 %v776_v45, %v772_v37  ;;  %v996_v37 = vld [vmem:[%s3693_s3 + $0x38] sm:$0xff]  ;;  %v989_v45 = vld [vmem:[%s3693_s3] sm:$0xff] }
 0x233   :  { %2258 = vmatprep.subr.bf16.mxu1 %v2850_v52  ;;  %2226 = vmatprep.subr.bf16.mxu0 %v3137_v33  ;;  %v781_v52 = vld [vmem:[%s3693_s3 + $0x108] sm:$0xff] }
 0x236   :  { %2260 = vmatpush1.bf16.msra.mxu1 %v2880_v62  ;;  %2228 = vmatpush1.bf16.msra.mxu0 %v3145_v48  ;;  %v785_v62 = vld [vmem:[%s3693_s3 + $0x128] sm:$0xff] }
 0x237   :  { %2262 = vmatprep.subr.bf16.mxu1 %v2886_v0  ;;  %v3155_v0 = vpack.c.bf16 %v785_v62, %v781_v52  ;;  %v993_v52 = vld [vmem:[%s3693_s3 + $0x20] sm:$0xff]  ;;  %v3262_v62 = vpack.c.bf16 %v996_v37, %v992_v17  ;;  %v1039_v37 = vld [vmem:[%s3693_s3 + $0x190] sm:$0xff] }
 0x239   :  { %2230 = vmatprep.subr.bf16.mxu0 %v3155_v0 }
 0x23a   :  { %2264 = vmatpush1.bf16.msra.mxu1 %v2916_v15  ;;  %v780_v15 = vld [vmem:[%s3693_s3 + $0x100] sm:$0xff] }
 0x23b   :  { %2266 = vmatprep.subr.bf16.mxu1 %v2922_v18  ;;  %v784_v18 = vld [vmem:[%s3693_s3 + $0x120] sm:$0xff] }
 0x23e   :  { %2268 = vmatpush1.bf16.msra.mxu1 %v2949_v31  ;;  %v3163_v31 = vpack.c.bf16 %v784_v18, %v780_v15  ;;  %v3264_v15 = vpack.c.bf16 %v993_v52, %v989_v45  ;;  %v991_v18 = vld [vmem:[%s3693_s3 + $0x10] sm:$0xff]  ;;  %v1048_v52 = vld [vmem:[%s3693_s3 + $0x1d8] sm:$0xff] }
 0x23f   :  { %2270 = vmatprep.subr.bf16.mxu1 %v2952_v32  ;;  %v789_v32 = vld [vmem:[%s3693_s3 + $0x148] sm:$0xff]  ;;  %v1043_v45 = vld [vmem:[%s3693_s3 + $0x1b0] sm:$0xff] }
 0x240   :  { %2232 = vmatpush1.bf16.msra.mxu0 %v3163_v31 }
 0x242   :  { %2272 = vmatpush1.bf16.msra.mxu1 %v2971_v40  ;;  %v793_v40 = vld [vmem:[%s3693_s3 + $0x168] sm:$0xff] }
 0x243   :  { %2274 = vmatprep.subr.bf16.mxu1 %v2974_v41  ;;  %v788_v41 = vld [vmem:[%s3693_s3 + $0x140] sm:$0xff] }
 0x244   :  { %v3187_v21 = vpack.c.bf16 %v792_v16, %v788_v41  ;;  %v998_v41 = vld [vmem:[%s3693_s3 + $0x48] sm:$0xff] }
 0x245   :  { %v1002_v16 = vld [vmem:[%s3693_s3 + $0x68] sm:$0xff] }
 0x246   :  { %2276 = vmatpush1.bf16.msra.mxu1 %v2987_v49  ;;  %v3176_v49 = vpack.c.bf16 %v793_v40, %v789_v32  ;;  %v995_v32 = vld [vmem:[%s3693_s3 + $0x30] sm:$0xff]  ;;  %v3287_v20 = vpack.c.bf16 %v1002_v16, %v998_v41 }
 0x247   :  { %v3273_v40 = vpack.c.bf16 %v995_v32, %v991_v18  ;;  %2310 = vmatprep.subr.bf16.mxu1 %v3262_v62  ;;  %v1052_v18 = vld [vmem:[%s3693_s3 + $0x1f8] sm:$0xff]  ;;  %v3423_v32 = vpack.c.bf16 %v1043_v45, %v1039_v37  ;;  %v1047_v16 = vld [vmem:[%s3693_s3 + $0x1d0] sm:$0xff] }
 0x248   :  { %2234 = vmatprep.subr.bf16.mxu0 %v3176_v49  ;;  %v3426_v41 = vpack.c.bf16 %v1052_v18, %v1048_v52  ;;  %v3437_v28 = vpack.c.bf16 %v1051_v19, %v1047_v16 }
 0x249   :  { %2236 = vmatpush1.bf16.msra.mxu0 %v3187_v21 }
 0x24a   :  { %2238 = vmatprep.subr.bf16.mxu0 %v3189_v23 }
 0x24d   :  { %2240 = vmatpush1.bf16.msra.mxu0 %v3205_v36 }
 0x24e   :  { %2242 = vmatprep.subr.bf16.mxu0 %v3208_v38 }
 0x251   :  { %2244 = vmatpush1.bf16.msra.mxu0 %v3217_v47 }
 0x2fc   :  { %v637_v42 = vpop.f32.mrb[4].mxu0  ;;  %v708_v46 = vpop.f32.mrb[4].mxu1 }
 0x2fd   :  { %v713_v55 = vadd.f32 %v1973_v26, %v637_v42  ;;  %v639_v58 = vpop.f32.mrb[5].mxu0  ;;  %v710_v7 = vpop.f32.mrb[5].mxu1  ;;  %v715_v51 = vadd.f32 %v1975_v39, %v708_v46  ;;  %v1003_v26 = vld [vmem:[%s3693_s3 + $0x70] sm:$0xff]  ;;  %v1006_v42 = vld [vmem:[%s3693_s3 + $0x88] sm:$0xff]  ;;  %v1020_v39 = vld [vmem:[%s3693_s3 + $0xf8] sm:$0xff] }
 0x2fe   :  { %v714_v10 = vadd.f32 %v1974_v30, %v639_v58  ;;  %v716_v22 = vadd.f32 %v1976_v4, %v710_v7  ;;  %v3309_v30 = vpack.c.bf16 %v1003_v26, %v999_v44  ;;  %v1010_v46 = vld [vmem:[%s3693_s3 + $0xa8] sm:$0xff]  ;;  %v1012_v7 = vld [vmem:[%s3693_s3 + $0xb8] sm:$0xff] }
 0x2ff   :  { %v1977_v24 = vmul.f32 -1.442695, %v713_v55  ;;  %v1008_v55 = vld [vmem:[%s3693_s3 + $0x98] sm:$0xff]  ;;  %v3323_v58 = vpack.c.bf16 %v1010_v46, %v1006_v42 }
 0x300   :  { %v1978_v27 = vmul.f32 -1.442695, %v714_v10  ;;  %v1979_v50 = vmul.f32 -1.442695, %v716_v22  ;;  %v1007_v10 = vld [vmem:[%s3693_s3 + $0x90] sm:$0xff]  ;;  %v1016_v22 = vld [vmem:[%s3693_s3 + $0xd8] sm:$0xff] }
 0x301   :  { %2566 = vpow2.f32 %v1977_v24  ;;  %v1011_v24 = vld [vmem:[%s3693_s3 + $0xb0] sm:$0xff] }
 0x302   :  { %2568 = vpow2.f32 %v1978_v27  ;;  %v3334_v27 = vpack.c.bf16 %v1012_v7, %v1008_v55  ;;  %v3336_v4 = vpack.c.bf16 %v1011_v24, %v1007_v10 }
 0x303   :  { %2570 = vpow2.f32 %v1979_v50  ;;  %v3349_v50 = vpack.c.bf16 %v1020_v39, %v1016_v22  ;;  %v1984_v22 = vld [vmem:[%s3695_s0 + $0x78] sm:$0xff] }
 0x304   :  { %2572 = vtanh.f32 %v715_v51  ;;  %v1015_v51 = vld [vmem:[%s3693_s3 + $0xd0] sm:$0xff] }
 0x30b   :  { %v2567_v53 = vpop.eup %2566 }
 0x30c   :  { %v2569_v54 = vpop.eup %2568  ;;  %v720_v56 = vadd.f32 1.0, %v2567_v53  ;;  %v1019_v53 = vld [vmem:[%s3693_s3 + $0xf0] sm:$0xff] }
 0x30d   :  { %v726_v57 = vadd.f32 1.0, %v2569_v54  ;;  %v2571_v59 = vpop.eup %2570  ;;  %v3357_v54 = vpack.c.bf16 %v1019_v53, %v1015_v51  ;;  %v1983_v51 = vld [vmem:[%s3695_s0 + $0x70] sm:$0xff] }
 0x30e   :  { %2574 = vrcp.f32 %v720_v56  ;;  %v2573_v60 = vpop.eup %2572  ;;  %v733_v2 = vadd.f32 1.0, %v2571_v59  ;;  %v1024_v56 = vld [vmem:[%s3693_s3 + $0x118] sm:$0xff] }
 0x30f   :  { %2576 = vrcp.f32 %v726_v57  ;;  %v1028_v57 = vld [vmem:[%s3693_s3 + $0x138] sm:$0xff] }
 0x310   :  { %2578 = vrcp.f32 %v733_v2  ;;  %v3369_v59 = vpack.c.bf16 %v1028_v57, %v1024_v56  ;;  %v1036_v2 = vld [vmem:[%s3693_s3 + $0x178] sm:$0xff] }
 0x318   :  { %v2575_v61 = vpop.eup %2574 }
 0x319   :  { %v2577_v63 = vpop.eup %2576  ;;  %v737_v1 = vmul.f32 %v2575_v61, %v2573_v60  ;;  %v1023_v60 = vld [vmem:[%s3693_s3 + $0x110] sm:$0xff] }
 0x31a   :  { %v736_v5 = vmul.f32 %v2577_v63, %v3095_v6  ;;  %v2579_v12 = vpop.eup %2578  ;;  %v990_v6 = vld [vmem:[%s3693_s3 + $0x8] sm:$0xff]  ;;  %v1027_v61 = vld [vmem:[%s3693_s3 + $0x130] sm:$0xff] }
 0x31b   :  { %v3251_v25 = vpack.c.bf16 %v994_v9, %v990_v6  ;;  %v3377_v63 = vpack.c.bf16 %v1027_v61, %v1023_v60  ;;  %v1044_v6 = vld [vmem:[%s3693_s3 + $0x1b8] sm:$0xff] }
 0x31c   :  { %v3234_v11 = vadd.f32 %v737_v1, %v736_v5  ;;  %v1032_v1 = vld [vmem:[%s3693_s3 + $0x158] sm:$0xff]  ;;  %v1031_v5 = vld [vmem:[%s3693_s3 + $0x150] sm:$0xff] }
 0x31d   :  { %2278 = vmatprep.subr.bf16.mxu0 %v3251_v25 }
 0x31e   :  { %2580 = vtanh.f32 %v3234_v11 }
 0x328   :  { %v2581_v13 = vpop.eup %2580 }
 0x329   :  { %v740_v8 = vmul.f32 %v2581_v13, %v2579_v12  ;;  %v3390_v12 = vpack.c.bf16 %v1036_v2, %v1032_v1  ;;  %v1035_v13 = vld [vmem:[%s3693_s3 + $0x170] sm:$0xff] }
 0x32a   :  { %v3403_v9 = vpack.c.bf16 %v1035_v13, %v1031_v5 }
 0x32b   :  { %1980 = vst [vmem:[%s3697_s4 + $0x10] sm:$0xff] %v740_v8  ;;  %877 = vmatmul.mubr.f32.vlgmr.msra.gmra.mrb[6].mxu0 %v740_v8  ;;  %948 = vmatmul.mubr.f32.vlgmr.msra.gmra.mrb[6].mxu1 %v740_v8  ;;  %v1040_v8 = vld [vmem:[%s3693_s3 + $0x198] sm:$0xff] }
 0x32c   :  { %1117 = vmatprep.mubr.f32.mxu0 %v2662_v3  ;;  %1188 = vmatprep.mubr.f32.mxu1 %v2662_v3  ;;  %v3406_v17 = vpack.c.bf16 %v1044_v6, %v1040_v8 }
 0x32d   :  { %2280 = vmatpush1.bf16.msra.mxu0 %v3264_v15  ;;  %2312 = vmatpush1.bf16.msra.mxu1 %v3273_v40 }
 0x32e   :  { %2282 = vmatprep.subr.bf16.mxu0 %v3287_v20  ;;  %2314 = vmatprep.subr.bf16.mxu1 %v3298_v35 }
 0x331   :  { %2284 = vmatpush1.bf16.msra.mxu0 %v3300_v43  ;;  %2316 = vmatpush1.bf16.msra.mxu1 %v3309_v30 }
 0x332   :  { %2286 = vmatprep.subr.bf16.mxu0 %v3323_v58  ;;  %2318 = vmatprep.subr.bf16.mxu1 %v3334_v27 }
 0x335   :  { %2288 = vmatpush1.bf16.msra.mxu0 %v3128_v14  ;;  %2320 = vmatpush1.bf16.msra.mxu1 %v3336_v4 }
 0x336   :  { %2290 = vmatprep.subr.bf16.mxu0 %v3137_v33  ;;  %2322 = vmatprep.subr.bf16.mxu1 %v3349_v50 }
 0x339   :  { %2292 = vmatpush1.bf16.msra.mxu0 %v3145_v48  ;;  %2324 = vmatpush1.bf16.msra.mxu1 %v3357_v54 }
 0x33a   :  { %2294 = vmatprep.subr.bf16.mxu0 %v3155_v0  ;;  %2326 = vmatprep.subr.bf16.mxu1 %v3369_v59 }
 0x33d   :  { %2296 = vmatpush1.bf16.msra.mxu0 %v3163_v31  ;;  %2328 = vmatpush1.bf16.msra.mxu1 %v3377_v63 }
 0x33e   :  { %2298 = vmatprep.subr.bf16.mxu0 %v3176_v49  ;;  %2330 = vmatprep.subr.bf16.mxu1 %v3390_v12 }
 0x341   :  { %2300 = vmatpush1.bf16.msra.mxu0 %v3187_v21  ;;  %2332 = vmatpush1.bf16.msra.mxu1 %v3403_v9 }
 0x342   :  { %2302 = vmatprep.subr.bf16.mxu0 %v3189_v23  ;;  %2334 = vmatprep.subr.bf16.mxu1 %v3406_v17 }
 0x345   :  { %2304 = vmatpush1.bf16.msra.mxu0 %v3205_v36  ;;  %2336 = vmatpush1.bf16.msra.mxu1 %v3423_v32 }
 0x346   :  { %2306 = vmatprep.subr.bf16.mxu0 %v3208_v38  ;;  %2338 = vmatprep.subr.bf16.mxu1 %v3426_v41 }
 0x349   :  { %2308 = vmatpush1.bf16.msra.mxu0 %v3217_v47  ;;  %2340 = vmatpush1.bf16.msra.mxu1 %v3437_v28 }
 0x34a   :  { %2342 = vmatprep.subr.bf16.mxu0 %v3251_v25  ;;  %2374 = vmatprep.subr.bf16.mxu1 %v3262_v62 }
 0x3fe   :  { %v878_v44 = vpop.f32.mrb[6].mxu0  ;;  %v949_v26 = vpop.f32.mrb[6].mxu1 }
 0x3ff   :  { %v954_v42 = vadd.f32 %v1981_v29, %v878_v44  ;;  %v880_v46 = vpop.f32.mrb[7].mxu0  ;;  %v951_v55 = vpop.f32.mrb[7].mxu1  ;;  %v956_v56 = vadd.f32 %v1983_v51, %v949_v26  ;;  %v1990_v29 = vld [vmem:[%s3695_s0 + $0x88] sm:$0xff] }
 0x400   :  { %v955_v7 = vadd.f32 %v1982_v34, %v880_v46  ;;  %v957_v39 = vadd.f32 %v1984_v22, %v951_v55 }
 0x401   :  { %v1985_v10 = vmul.f32 -1.442695, %v954_v42 }
 0x402   :  { %v1986_v24 = vmul.f32 -1.442695, %v955_v7  ;;  %v1987_v53 = vmul.f32 -1.442695, %v957_v39  ;;  %v1991_v39 = vld [vmem:[%s3695_s0 + $0x90] sm:$0xff] }
 0x403   :  { %2582 = vpow2.f32 %v1985_v10 }
 0x404   :  { %2584 = vpow2.f32 %v1986_v24  ;;  %v1992_v24 = vld [vmem:[%s3695_s0 + $0x98] sm:$0xff] }
 0x405   :  { %2586 = vpow2.f32 %v1987_v53 }
 0x406   :  { %2588 = vtanh.f32 %v956_v56 }
 0x40d   :  { %v2583_v57 = vpop.eup %2582 }
 0x40e   :  { %v2585_v60 = vpop.eup %2584  ;;  %v961_v61 = vadd.f32 1.0, %v2583_v57 }
 0x40f   :  { %v967_v1 = vadd.f32 1.0, %v2585_v60  ;;  %v2587_v2 = vpop.eup %2586 }
 0x410   :  { %2590 = vrcp.f32 %v961_v61  ;;  %v2589_v5 = vpop.eup %2588  ;;  %v974_v37 = vadd.f32 1.0, %v2587_v2 }
 0x411   :  { %2592 = vrcp.f32 %v967_v1 }
 0x412   :  { %2594 = vrcp.f32 %v974_v37 }
 0x41a   :  { %v2591_v13 = vpop.eup %2590 }
 0x41b   :  { %v2593_v8 = vpop.eup %2592  ;;  %v978_v6 = vmul.f32 %v2591_v13, %v2589_v5 }
 0x41c   :  { %v977_v45 = vmul.f32 %v2593_v8, %v3234_v11  ;;  %v2595_v18 = vpop.eup %2594  ;;  %v1989_v11 = vld [vmem:[%s3695_s0 + $0x80] sm:$0xff] }
 0x41e   :  { %v3457_v52 = vadd.f32 %v978_v6, %v977_v45 }
 0x420   :  { %2596 = vtanh.f32 %v3457_v52 }
 0x42a   :  { %v2597_v16 = vpop.eup %2596 }
 0x42b   :  { %v981_v19 = vmul.f32 %v2597_v16, %v2595_v18 }
 0x42d   :  { %1988 = vst [vmem:[%s3697_s4 + $0x18] sm:$0xff] %v981_v19  ;;  %1118 = vmatmul.mubr.f32.vlgmr.msra.gmra.mrb[8].mxu0 %v981_v19  ;;  %1189 = vmatmul.mubr.f32.vlgmr.msra.gmra.mrb[8].mxu1 %v981_v19 }
 0x42e   :  { %2344 = vmatpush1.bf16.msra.mxu0 %v3264_v15  ;;  %2376 = vmatpush1.bf16.msra.mxu1 %v3273_v40 }
 0x42f   :  { %2346 = vmatprep.subr.bf16.mxu0 %v3287_v20  ;;  %2378 = vmatprep.subr.bf16.mxu1 %v3298_v35 }
 0x430   :  { %1358 = vmatprep.mubr.f32.mxu0 %v2662_v3  ;;  %1429 = vmatprep.mubr.f32.mxu1 %v2662_v3 }
 0x432   :  { %2348 = vmatpush1.bf16.msra.mxu0 %v3300_v43  ;;  %2380 = vmatpush1.bf16.msra.mxu1 %v3309_v30 }
 0x433   :  { %2350 = vmatprep.subr.bf16.mxu0 %v3323_v58  ;;  %2382 = vmatprep.subr.bf16.mxu1 %v3334_v27 }
 0x436   :  { %2352 = vmatpush1.bf16.msra.mxu0 %v3128_v14  ;;  %2384 = vmatpush1.bf16.msra.mxu1 %v3336_v4 }
 0x437   :  { %2354 = vmatprep.subr.bf16.mxu0 %v3137_v33  ;;  %2386 = vmatprep.subr.bf16.mxu1 %v3349_v50 }
 0x43a   :  { %2356 = vmatpush1.bf16.msra.mxu0 %v3145_v48  ;;  %2388 = vmatpush1.bf16.msra.mxu1 %v3357_v54 }
 0x43b   :  { %2358 = vmatprep.subr.bf16.mxu0 %v3155_v0  ;;  %2390 = vmatprep.subr.bf16.mxu1 %v3369_v59 }
 0x43e   :  { %2360 = vmatpush1.bf16.msra.mxu0 %v3163_v31  ;;  %2392 = vmatpush1.bf16.msra.mxu1 %v3377_v63 }
 0x43f   :  { %2362 = vmatprep.subr.bf16.mxu0 %v3176_v49  ;;  %2394 = vmatprep.subr.bf16.mxu1 %v3390_v12 }
 0x442   :  { %2364 = vmatpush1.bf16.msra.mxu0 %v3187_v21  ;;  %2396 = vmatpush1.bf16.msra.mxu1 %v3403_v9 }
 0x443   :  { %2366 = vmatprep.subr.bf16.mxu0 %v3189_v23  ;;  %2398 = vmatprep.subr.bf16.mxu1 %v3406_v17 }
 0x446   :  { %2368 = vmatpush1.bf16.msra.mxu0 %v3205_v36  ;;  %2400 = vmatpush1.bf16.msra.mxu1 %v3423_v32 }
 0x447   :  { %2370 = vmatprep.subr.bf16.mxu0 %v3208_v38  ;;  %2402 = vmatprep.subr.bf16.mxu1 %v3426_v41 }
 0x44a   :  { %2372 = vmatpush1.bf16.msra.mxu0 %v3217_v47  ;;  %2404 = vmatpush1.bf16.msra.mxu1 %v3437_v28 }
 0x44b   :  { %2406 = vmatprep.subr.bf16.mxu0 %v3251_v25  ;;  %2438 = vmatprep.subr.bf16.mxu1 %v3262_v62 }
 0x500   :  { %v1119_v34 = vpop.f32.mrb[8].mxu0  ;;  %v1190_v44 = vpop.f32.mrb[8].mxu1 }
 0x501   :  { %v1195_v26 = vadd.f32 %v1989_v11, %v1119_v34  ;;  %v1121_v42 = vpop.f32.mrb[9].mxu0  ;;  %v1192_v46 = vpop.f32.mrb[9].mxu1  ;;  %v1197_v53 = vadd.f32 %v1991_v39, %v1190_v44 }
 0x502   :  { %v1196_v55 = vadd.f32 %v1990_v29, %v1121_v42  ;;  %v1198_v22 = vadd.f32 %v1992_v24, %v1192_v46 }
 0x503   :  { %v1993_v7 = vmul.f32 -1.442695, %v1195_v26 }
 0x504   :  { %v1994_v10 = vmul.f32 -1.442695, %v1196_v55  ;;  %v1995_v51 = vmul.f32 -1.442695, %v1198_v22 }
 0x505   :  { %2598 = vpow2.f32 %v1993_v7 }
 0x506   :  { %2600 = vpow2.f32 %v1994_v10 }
 0x507   :  { %2602 = vpow2.f32 %v1995_v51 }
 0x508   :  { %2604 = vtanh.f32 %v1197_v53 }
 0x50f   :  { %v2599_v56 = vpop.eup %2598 }
 0x510   :  { %v2601_v57 = vpop.eup %2600  ;;  %v1202_v60 = vadd.f32 1.0, %v2599_v56 }
 0x511   :  { %v1208_v61 = vadd.f32 1.0, %v2601_v57  ;;  %v2603_v1 = vpop.eup %2602  ;;  %v1761_v57 = vld [vmem:[%s3693_s3 + $0x188] sm:$0xff] }
 0x512   :  { %2606 = vrcp.f32 %v1202_v60  ;;  %v2605_v2 = vpop.eup %2604  ;;  %v1215_v6 = vadd.f32 1.0, %v2603_v1  ;;  %v1765_v60 = vld [vmem:[%s3693_s3 + $0x1a8] sm:$0xff] }
 0x513   :  { %2608 = vrcp.f32 %v1208_v61  ;;  %v2493_v1 = vpack.c.bf16 %v1765_v60, %v1761_v57 }
 0x514   :  { %2610 = vrcp.f32 %v1215_v6 }
 0x51c   :  { %v2607_v5 = vpop.eup %2606 }
 0x51d   :  { %v2609_v13 = vpop.eup %2608  ;;  %v1219_v8 = vmul.f32 %v2607_v5, %v2605_v2  ;;  %v1760_v2 = vld [vmem:[%s3693_s3 + $0x180] sm:$0xff] }
 0x51e   :  { %v1218_v37 = vmul.f32 %v2609_v13, %v3457_v52  ;;  %v2611_v18 = vpop.eup %2610  ;;  %v1764_v5 = vld [vmem:[%s3693_s3 + $0x1a0] sm:$0xff]  ;;  %v1769_v13 = vld [vmem:[%s3693_s3 + $0x1c8] sm:$0xff] }
 0x51f   :  { %v2495_v6 = vpack.c.bf16 %v1764_v5, %v1760_v2 }
 0x520   :  { %v3510_v45 = vadd.f32 %v1219_v8, %v1218_v37  ;;  %v1773_v8 = vld [vmem:[%s3693_s3 + $0x1e8] sm:$0xff] }
 0x521   :  { %v2497_v37 = vpack.c.bf16 %v1773_v8, %v1769_v13 }
 0x522   :  { %2612 = vtanh.f32 %v3510_v45 }
 0x52c   :  { %v2613_v16 = vpop.eup %2612 }
 0x52d   :  { %v1222_v19 = vmul.f32 %v2613_v16, %v2611_v18  ;;  %v1772_v18 = vld [vmem:[%s3693_s3 + $0x1e0] sm:$0xff] }
 0x52f   :  { %1996 = vst [vmem:[%s3697_s4 + $0x20] sm:$0xff] %v1222_v19  ;;  %1359 = vmatmul.mubr.f32.vlgmr.msra.gmra.mrb[10].mxu0 %v1222_v19  ;;  %1430 = vmatmul.mubr.f32.vlgmr.msra.gmra.mrb[10].mxu1 %v1222_v19  ;;  %v2005_v19 = vld [vmem:[%s3695_s0 + $0xc0] sm:$0xff] }
 0x530   :  { %2408 = vmatpush1.bf16.msra.mxu0 %v3264_v15  ;;  %2440 = vmatpush1.bf16.msra.mxu1 %v3273_v40 }
 0x531   :  { %2410 = vmatprep.subr.bf16.mxu0 %v3287_v20  ;;  %2442 = vmatprep.subr.bf16.mxu1 %v3298_v35 }
 0x532   :  { %1599 = vmatprep.mubr.f32.mxu0 %v2662_v3  ;;  %1670 = vmatprep.mubr.f32.mxu1 %v2662_v3 }
 0x534   :  { %2412 = vmatpush1.bf16.msra.mxu0 %v3300_v43  ;;  %2444 = vmatpush1.bf16.msra.mxu1 %v3309_v30 }
 0x535   :  { %2414 = vmatprep.subr.bf16.mxu0 %v3323_v58  ;;  %2446 = vmatprep.subr.bf16.mxu1 %v3334_v27 }
 0x538   :  { %2416 = vmatpush1.bf16.msra.mxu0 %v3128_v14  ;;  %2448 = vmatpush1.bf16.msra.mxu1 %v3336_v4  ;;  %v1997_v14 = vld [vmem:[%s3695_s0 + $0xa0] sm:$0xff] }
 0x539   :  { %2418 = vmatprep.subr.bf16.mxu0 %v3137_v33  ;;  %2450 = vmatprep.subr.bf16.mxu1 %v3349_v50  ;;  %v1998_v33 = vld [vmem:[%s3695_s0 + $0xa8] sm:$0xff] }
 0x53c   :  { %2420 = vmatpush1.bf16.msra.mxu0 %v3145_v48  ;;  %2452 = vmatpush1.bf16.msra.mxu1 %v3357_v54 }
 0x53d   :  { %2422 = vmatprep.subr.bf16.mxu0 %v3155_v0  ;;  %2454 = vmatprep.subr.bf16.mxu1 %v3369_v59 }
 0x540   :  { %2424 = vmatpush1.bf16.msra.mxu0 %v3163_v31  ;;  %2456 = vmatpush1.bf16.msra.mxu1 %v3377_v63 }
 0x541   :  { %2426 = vmatprep.subr.bf16.mxu0 %v3176_v49  ;;  %2458 = vmatprep.subr.bf16.mxu1 %v3390_v12 }
 0x544   :  { %2428 = vmatpush1.bf16.msra.mxu0 %v3187_v21  ;;  %2460 = vmatpush1.bf16.msra.mxu1 %v3403_v9 }
 0x545   :  { %2430 = vmatprep.subr.bf16.mxu0 %v3189_v23  ;;  %2462 = vmatprep.subr.bf16.mxu1 %v3406_v17 }
 0x548   :  { %2432 = vmatpush1.bf16.msra.mxu0 %v3205_v36  ;;  %2464 = vmatpush1.bf16.msra.mxu1 %v3423_v32 }
 0x549   :  { %2434 = vmatprep.subr.bf16.mxu0 %v3208_v38  ;;  %2466 = vmatprep.subr.bf16.mxu1 %v3426_v41 }
 0x54c   :  { %2436 = vmatpush1.bf16.msra.mxu0 %v3217_v47  ;;  %2468 = vmatpush1.bf16.msra.mxu1 %v3437_v28  ;;  %v2000_v47 = vld [vmem:[%s3695_s0 + $0xb8] sm:$0xff] }
 0x54d   :  { %2470 = vmatprep.subr.bf16.mxu0 %v3251_v25  ;;  %2502 = vmatprep.subr.bf16.mxu1 %v3262_v62  ;;  %v1999_v62 = vld [vmem:[%s3695_s0 + $0xb0] sm:$0xff] }
 0x602   :  { %v1360_v48 = vpop.f32.mrb[10].mxu0  ;;  %v1431_v0 = vpop.f32.mrb[10].mxu1 }
 0x603   :  { %v1436_v31 = vadd.f32 %v1997_v14, %v1360_v48  ;;  %v1362_v49 = vpop.f32.mrb[11].mxu0  ;;  %v1433_v21 = vpop.f32.mrb[11].mxu1  ;;  %v1438_v11 = vadd.f32 %v1999_v62, %v1431_v0  ;;  %v2006_v14 = vld [vmem:[%s3695_s0 + $0xc8] sm:$0xff] }
 0x604   :  { %v1437_v23 = vadd.f32 %v1998_v33, %v1362_v49  ;;  %v1439_v25 = vadd.f32 %v2000_v47, %v1433_v21 }
 0x605   :  { %v2001_v36 = vmul.f32 -1.442695, %v1436_v31 }
 0x606   :  { %v2002_v38 = vmul.f32 -1.442695, %v1437_v23  ;;  %v2003_v52 = vmul.f32 -1.442695, %v1439_v25  ;;  %v2007_v25 = vld [vmem:[%s3695_s0 + $0xd0] sm:$0xff] }
 0x607   :  { %2614 = vpow2.f32 %v2001_v36 }
 0x608   :  { %2616 = vpow2.f32 %v2002_v38  ;;  %v2008_v38 = vld [vmem:[%s3695_s0 + $0xd8] sm:$0xff] }
 0x609   :  { %2618 = vpow2.f32 %v2003_v52 }
 0x60a   :  { %2620 = vtanh.f32 %v1438_v11 }
 0x611   :  { %v2615_v29 = vpop.eup %2614 }
 0x612   :  { %v2617_v34 = vpop.eup %2616  ;;  %v1443_v44 = vadd.f32 1.0, %v2615_v29 }
 0x613   :  { %v1449_v26 = vadd.f32 1.0, %v2617_v34  ;;  %v2619_v42 = vpop.eup %2618 }
 0x614   :  { %2622 = vrcp.f32 %v1443_v44  ;;  %v2621_v46 = vpop.eup %2620  ;;  %v1456_v24 = vadd.f32 1.0, %v2619_v42 }
 0x615   :  { %2624 = vrcp.f32 %v1449_v26 }
 0x616   :  { %2626 = vrcp.f32 %v1456_v24 }
 0x61e   :  { %v2623_v55 = vpop.eup %2622 }
 0x61f   :  { %v2625_v7 = vpop.eup %2624  ;;  %v1460_v10 = vmul.f32 %v2623_v55, %v2621_v46 }
 0x620   :  { %v1459_v22 = vmul.f32 %v2625_v7, %v3510_v45  ;;  %v2627_v51 = vpop.eup %2626  ;;  %v1768_v45 = vld [vmem:[%s3693_s3 + $0x1c0] sm:$0xff] }
 0x621   :  { %v2499_v16 = vpack.c.bf16 %v1772_v18, %v1768_v45 }
 0x622   :  { %v3563_v39 = vadd.f32 %v1460_v10, %v1459_v22 }
 0x624   :  { %2628 = vtanh.f32 %v3563_v39 }
 0x62e   :  { %v2629_v53 = vpop.eup %2628 }
 0x62f   :  { %v1463_v56 = vmul.f32 %v2629_v53, %v2627_v51 }
 0x631   :  { %2004 = vst [vmem:[%s3697_s4 + $0x28] sm:$0xff] %v1463_v56  ;;  %1600 = vmatmul.mubr.f32.vlgmr.msra.gmra.mrb[12].mxu0 %v1463_v56  ;;  %1671 = vmatmul.mubr.f32.vlgmr.msra.gmra.mrb[12].mxu1 %v1463_v56 }
 0x632   :  { %2472 = vmatpush1.bf16.msra.mxu0 %v3264_v15  ;;  %2504 = vmatpush1.bf16.msra.mxu1 %v3273_v40  ;;  %v1732_v15 = vld [vmem:[%s3693_s3 + $0xa0] sm:$0xff] }
 0x633   :  { %2474 = vmatprep.subr.bf16.mxu0 %v3287_v20  ;;  %2506 = vmatprep.subr.bf16.mxu1 %v3298_v35  ;;  %v1737_v20 = vld [vmem:[%s3693_s3 + $0xc8] sm:$0xff] }
 0x634   :  { %1840 = vmatprep.mubr.f32.mxu0 %v2662_v3  ;;  %1911 = vmatprep.mubr.f32.mxu1 %v2662_v3  ;;  %v1728_v3 = vld [vmem:[%s3693_s3 + $0x80] sm:$0xff]  ;;  %v1741_v35 = vld [vmem:[%s3693_s3 + $0xe8] sm:$0xff] }
 0x635   :  { %v2479_v40 = vpack.c.bf16 %v1732_v15, %v1728_v3  ;;  %v2013_v3 = vld [vmem:[%s3695_s0 + $0xe0] sm:$0xff] }
 0x636   :  { %2476 = vmatpush1.bf16.msra.mxu0 %v3300_v43  ;;  %2508 = vmatpush1.bf16.msra.mxu1 %v3309_v30  ;;  %v2481_v43 = vpack.c.bf16 %v1741_v35, %v1737_v20  ;;  %v1736_v30 = vld [vmem:[%s3693_s3 + $0xc0] sm:$0xff] }
 0x637   :  { %2478 = vmatprep.subr.bf16.mxu0 %v3323_v58  ;;  %2510 = vmatprep.subr.bf16.mxu1 %v3334_v27  ;;  %v1740_v58 = vld [vmem:[%s3693_s3 + $0xe0] sm:$0xff] }
 0x638   :  { %v2483_v27 = vpack.c.bf16 %v1740_v58, %v1736_v30 }
 0x63a   :  { %2512 = vmatpush1.bf16.msra.mxu1 %v3336_v4  ;;  %2480 = vmatpush1.bf16.msra.mxu0 %v2479_v40  ;;  %v1745_v4 = vld [vmem:[%s3693_s3 + $0x108] sm:$0xff] }
 0x63b   :  { %2514 = vmatprep.subr.bf16.mxu1 %v3349_v50  ;;  %2482 = vmatprep.subr.bf16.mxu0 %v2481_v43  ;;  %v1749_v50 = vld [vmem:[%s3693_s3 + $0x128] sm:$0xff] }
 0x63e   :  { %2516 = vmatpush1.bf16.msra.mxu1 %v3357_v54  ;;  %2484 = vmatpush1.bf16.msra.mxu0 %v2483_v27  ;;  %v2485_v54 = vpack.c.bf16 %v1749_v50, %v1745_v4  ;;  %v2016_v4 = vld [vmem:[%s3695_s0 + $0xf8] sm:$0xff] }
 0x63f   :  { %2518 = vmatprep.subr.bf16.mxu1 %v3369_v59  ;;  %v1744_v59 = vld [vmem:[%s3693_s3 + $0x100] sm:$0xff] }
 0x640   :  { %2486 = vmatprep.subr.bf16.mxu0 %v2485_v54  ;;  %v2015_v54 = vld [vmem:[%s3695_s0 + $0xf0] sm:$0xff] }
 0x642   :  { %2520 = vmatpush1.bf16.msra.mxu1 %v3377_v63  ;;  %v1748_v63 = vld [vmem:[%s3693_s3 + $0x120] sm:$0xff] }
 0x643   :  { %2522 = vmatprep.subr.bf16.mxu1 %v3390_v12  ;;  %v2487_v12 = vpack.c.bf16 %v1748_v63, %v1744_v59 }
 0x645   :  { %2488 = vmatpush1.bf16.msra.mxu0 %v2487_v12 }
 0x646   :  { %2524 = vmatpush1.bf16.msra.mxu1 %v3403_v9  ;;  %v1753_v9 = vld [vmem:[%s3693_s3 + $0x148] sm:$0xff] }
 0x647   :  { %2526 = vmatprep.subr.bf16.mxu1 %v3406_v17  ;;  %v1757_v17 = vld [vmem:[%s3693_s3 + $0x168] sm:$0xff] }
 0x64a   :  { %2528 = vmatpush1.bf16.msra.mxu1 %v3423_v32  ;;  %v1752_v32 = vld [vmem:[%s3693_s3 + $0x140] sm:$0xff] }
 0x64b   :  { %2530 = vmatprep.subr.bf16.mxu1 %v3426_v41  ;;  %v2489_v41 = vpack.c.bf16 %v1757_v17, %v1753_v9 }
 0x64d   :  { %2490 = vmatprep.subr.bf16.mxu0 %v2489_v41 }
 0x64e   :  { %2532 = vmatpush1.bf16.msra.mxu1 %v3437_v28  ;;  %v1756_v28 = vld [vmem:[%s3693_s3 + $0x160] sm:$0xff] }
 0x64f   :  { %v2491_v61 = vpack.c.bf16 %v1756_v28, %v1752_v32 }
 0x651   :  { %2492 = vmatpush1.bf16.msra.mxu0 %v2491_v61 }
 0x652   :  { %2494 = vmatprep.subr.bf16.mxu0 %v2493_v1 }
 0x655   :  { %2496 = vmatpush1.bf16.msra.mxu0 %v2495_v6 }
 0x656   :  { %2498 = vmatprep.subr.bf16.mxu0 %v2497_v37 }
 0x659   :  { %2500 = vmatpush1.bf16.msra.mxu0 %v2499_v16 }
 0x704   :  { %v1601_v33 = vpop.f32.mrb[12].mxu0  ;;  %v1672_v48 = vpop.f32.mrb[12].mxu1 }
 0x705   :  { %v1677_v0 = vadd.f32 %v2005_v19, %v1601_v33  ;;  %v1603_v31 = vpop.f32.mrb[13].mxu0  ;;  %v1674_v49 = vpop.f32.mrb[13].mxu1  ;;  %v1679_v52 = vadd.f32 %v2007_v25, %v1672_v48 }
 0x706   :  { %v1678_v21 = vadd.f32 %v2006_v14, %v1603_v31  ;;  %v1680_v47 = vadd.f32 %v2008_v38, %v1674_v49 }
 0x707   :  { %v2009_v23 = vmul.f32 -1.442695, %v1677_v0 }
 0x708   :  { %v2010_v36 = vmul.f32 -1.442695, %v1678_v21  ;;  %v2011_v62 = vmul.f32 -1.442695, %v1680_v47 }
 0x709   :  { %2630 = vpow2.f32 %v2009_v23 }
 0x70a   :  { %2632 = vpow2.f32 %v2010_v36 }
 0x70b   :  { %2634 = vpow2.f32 %v2011_v62 }
 0x70c   :  { %2636 = vtanh.f32 %v1679_v52 }
 0x713   :  { %v2631_v11 = vpop.eup %2630 }
 0x714   :  { %v2633_v29 = vpop.eup %2632  ;;  %v1684_v34 = vadd.f32 1.0, %v2631_v11 }
 0x715   :  { %v1690_v44 = vadd.f32 1.0, %v2633_v29  ;;  %v2635_v26 = vpop.eup %2634 }
 0x716   :  { %2638 = vrcp.f32 %v1684_v34  ;;  %v2637_v42 = vpop.eup %2636  ;;  %v1697_v10 = vadd.f32 1.0, %v2635_v26 }
 0x717   :  { %2640 = vrcp.f32 %v1690_v44 }
 0x718   :  { %2642 = vrcp.f32 %v1697_v10 }
 0x720   :  { %v2639_v46 = vpop.eup %2638 }
 0x721   :  { %v2641_v55 = vpop.eup %2640  ;;  %v1701_v7 = vmul.f32 %v2639_v46, %v2637_v42 }
 0x722   :  { %v1700_v24 = vmul.f32 %v2641_v55, %v3563_v39  ;;  %v2643_v51 = vpop.eup %2642  ;;  %v2014_v39 = vld [vmem:[%s3695_s0 + $0xe8] sm:$0xff] }
 0x724   :  { %v1702_v22 = vadd.f32 %v1701_v7, %v1700_v24 }
 0x726   :  { %2644 = vtanh.f32 %v1702_v22 }
 0x730   :  { %v2645_v53 = vpop.eup %2644 }
 0x731   :  { %v1704_v56 = vmul.f32 %v2645_v53, %v2643_v51 }
 0x733   :  { %2012 = vst [vmem:[%s3697_s4 + $0x30] sm:$0xff] %v1704_v56  ;;  %1841 = vmatmul.mubr.f32.vlgmr.msra.gmra.mrb[14].mxu0 %v1704_v56  ;;  %1912 = vmatmul.mubr.f32.vlgmr.msra.gmra.mrb[14].mxu1 %v1704_v56 }
 0x806   :  { %v1842_v15 = vpop.f32.mrb[14].mxu0  ;;  %v1913_v40 = vpop.f32.mrb[14].mxu1 }
 0x807   :  { %v1918_v20 = vadd.f32 %v2013_v3, %v1842_v15  ;;  %v1844_v35 = vpop.f32.mrb[15].mxu0  ;;  %v1915_v43 = vpop.f32.mrb[15].mxu1  ;;  %v1920_v63 = vadd.f32 %v2015_v54, %v1913_v40 }
 0x808   :  { %v1919_v30 = vadd.f32 %v2014_v39, %v1844_v35  ;;  %v1921_v50 = vadd.f32 %v2016_v4, %v1915_v43 }
 0x809   :  { %v2017_v58 = vmul.f32 -1.442695, %v1918_v20 }
 0x80a   :  { %v2018_v27 = vmul.f32 -1.442695, %v1919_v30  ;;  %v2019_v59 = vmul.f32 -1.442695, %v1921_v50 }
 0x80b   :  { %2646 = vpow2.f32 %v2017_v58 }
 0x80c   :  { %2648 = vpow2.f32 %v2018_v27 }
 0x80d   :  { %2650 = vpow2.f32 %v2019_v59 }
 0x80e   :  { %2652 = vtanh.f32 %v1920_v63 }
 0x815   :  { %v2647_v12 = vpop.eup %2646 }
 0x816   :  { %v2649_v9 = vpop.eup %2648  ;;  %v1925_v17 = vadd.f32 1.0, %v2647_v12 }
 0x817   :  { %v1931_v32 = vadd.f32 1.0, %v2649_v9  ;;  %v2651_v41 = vpop.eup %2650 }
 0x818   :  { %2654 = vrcp.f32 %v1925_v17  ;;  %v2653_v28 = vpop.eup %2652  ;;  %v1938_v1 = vadd.f32 1.0, %v2651_v41 }
 0x819   :  { %2656 = vrcp.f32 %v1931_v32 }
 0x81a   :  { %2658 = vrcp.f32 %v1938_v1 }
 0x822   :  { %v2655_v57 = vpop.eup %2654 }
 0x823   :  { %v2657_v60 = vpop.eup %2656  ;;  %v1942_v61 = vmul.f32 %v2655_v57, %v2653_v28 }
 0x824   :  { %v1941_v2 = vmul.f32 %v2657_v60, %v1702_v22  ;;  %v2659_v13 = vpop.eup %2658 }
 0x826   :  { %v1943_v5 = vadd.f32 %v1942_v61, %v1941_v2 }
 0x828   :  { %2660 = vtanh.f32 %v1943_v5  ;;  %1949 = vst [vmem:[%s3698_s6] sm:$0xff] %v1943_v5 }
 0x832   :  { %v2661_v8 = vpop.eup %2660 }
 0x833   :  { %v1945_v6 = vmul.f32 %v2661_v8, %v2659_v13 }
 0x835   :  { %2020 = vst [vmem:[%s3697_s4 + $0x38] sm:$0xff] %v1945_v6  ;;  %1948 = vst [vmem:[%s3699_s5] sm:$0xff] %v1945_v6 }

</bundles_post_ra>
